<compile_context>
chip_gen: v7x
topology: tpu7x:2x2x1
jax: 0.10.0
libtpu: 0.0.40
codegen_flags: <defaults>
</compile_context>

<pallas_src>
from math import sqrt

import jax
import jax.numpy as jnp
from jax.experimental import pallas as pl
from jax.experimental.pallas import tpu as pltpu

SUBLANE = 8    # f32 sublane tile
LANE = 128     # lane tile


def _round_up(n, m):
    return ((n + m - 1) // m) * m


def make_lstm_kernel(L, T, B_pad, H, matmul_dtype):
    """Build a Pallas kernel for an L-layer LSTM + FC head (whole problem in VMEM)."""

    def kernel(*refs):
        # inputs: x_flat, (w_ih, w_hh, b) * L, fc_w, fc_b   outputs: out   scratch: seq
        x_ref = refs[0]
        w_refs = refs[1:1 + 3 * L]
        fc_w_ref = refs[1 + 3 * L]
        fc_b_ref = refs[2 + 3 * L]
        out_ref = refs[3 + 3 * L]
        seq_ref = refs[4 + 3 * L]          # (T*B_pad, H) f32 — reused in place per layer

        h_last = None
        for l in range(L):                  # layers unrolled statically (L is small)
            w_ih = w_refs[3 * l][...]       # (in_dim, 4H)  matmul_dtype
            w_hh = w_refs[3 * l + 1][...]   # (H, 4H)       matmul_dtype
            bias = w_refs[3 * l + 2][...]   # (1, 4H)       f32

            # One-shot input projection (+ folded bias) for all timesteps:
            # (T*B_pad, in) @ (in, 4H) — off the serial recurrence path.
            in_flat = x_ref[...] if l == 0 else seq_ref[...]
            gates_x = jnp.dot(in_flat.astype(matmul_dtype), w_ih,
                              preferred_element_type=jnp.float32) + bias  # (T*B_pad, 4H)

            h = jnp.zeros((B_pad, H), jnp.float32)
            c = jnp.zeros((B_pad, H), jnp.float32)

            # TODO(synk): stage W_hh in the MXU across the unrolled time loop
            # (pltpu.matmul_push_rhs / matmul_acc_lhs / matmul_pop) to drop the
            # T-1 per-step RHS weight reloads from the latency-bound chain; the
            # implicit jnp.dot form is kept here for portability across the
            # v5e/v6e MRF vs v7x MRB result paths.
            #
            # Fully unrolled recurrence (T is small & static).
            # TODO(synk): if T scales, switch to lax.fori_loop with (h, c) carries
            # and pl.ds(pl.multiple_of(t*B_pad, 8), B_pad) indexing to bound live
            # ranges / vreg pressure.
            for t in range(T):
                # Per-step tile is a full sublane-aligned (8, 4H) block.
                g = gates_x[t * B_pad:(t + 1) * B_pad, :] + jnp.dot(
                    h.astype(matmul_dtype), w_hh,
                    preferred_element_type=jnp.float32)          # (B_pad, 4H)

                # Full-width nonlinearities: 1 sigmoid + 1 tanh EUP push per step.
                # Gate math stays f32 (v5e VPU/EUP have no bf16 path).
                sig = jax.nn.sigmoid(g)
                tnh = jnp.tanh(g)

                # Gate order (i, f, g, o) at lane offsets 0/H/2H/3H. The cell
                # candidate (offset 2H) is brought to lanes 0..H-1 with a
                # half-width XLU roll (shift == 2H is symmetric, so it is
                # rotation-direction independent); i/f/o use static slices.
                i_g = sig[:, 0 * H:1 * H]
                f_g = sig[:, 1 * H:2 * H]
                o_g = sig[:, 3 * H:4 * H]
                g_g = pltpu.roll(tnh, 2 * H, axis=1)[:, 0:H]

                c = f_g * c + i_g * g_g
                h = o_g * jnp.tanh(c)

                if l < L - 1:               # last layer never stores its sequence
                    seq_ref[t * B_pad:(t + 1) * B_pad, :] = h

            h_last = h

        # fc(out[:, -1, :]) — (B_pad, H) @ (H, O_pad); lane-dense (8, 128) store.
        out_ref[...] = (jnp.dot(h_last.astype(matmul_dtype), fc_w_ref[...],
                                preferred_element_type=jnp.float32)
                        + fc_b_ref[...])

    return kernel


def lstm_model_forward(x, layer_params, fc_w, fc_b, *, matmul_dtype=jnp.float32):
    """x: (B, T, input_dim) float32 (batch_first, like the PyTorch module)."""
    B, T, I = x.shape
    L = len(layer_params)
    H = layer_params[0][1].shape[1]  # w_hh_l0: (4H, H)
    O = fc_w.shape[0]

    B_pad = _round_up(max(B, SUBLANE), SUBLANE)   # full sublane tile per timestep
    O_pad = _round_up(max(O, LANE), LANE)         # lane-dense fc output store

    # glue: time-major, batch-padded, flattened input (T*B_pad, I)
    x_tm = jnp.transpose(x, (1, 0, 2)).astype(jnp.float32)          # (T, B, I)
    x_tm = jnp.pad(x_tm, ((0, 0), (0, B_pad - B), (0, 0)))          # (T, B_pad, I)
    x_flat = x_tm.reshape(T * B_pad, I)

    kernel_inputs = [x_flat]
    for (w_ih, w_hh, b_ih, b_hh) in layer_params:
        kernel_inputs.append(jnp.transpose(w_ih).astype(matmul_dtype))           # (in, 4H)
        kernel_inputs.append(jnp.transpose(w_hh).astype(matmul_dtype))           # (H, 4H)
        kernel_inputs.append((b_ih + b_hh).reshape(1, -1).astype(jnp.float32))   # (1, 4H)
    fc_w_p = jnp.pad(jnp.transpose(fc_w).astype(matmul_dtype),
                     ((0, 0), (0, O_pad - O)))                                    # (H, O_pad)
    fc_b_p = jnp.pad(fc_b.reshape(1, -1).astype(jnp.float32),
                     ((0, 0), (0, O_pad - O)))                                    # (1, O_pad)
    kernel_inputs += [fc_w_p, fc_b_p]

    kernel = make_lstm_kernel(L, T, B_pad, H, matmul_dtype)
    vmem = pl.BlockSpec(memory_space=pltpu.MemorySpace.VMEM)

    # TODO(synk): for large batch / many independent sequences, add a leading
    # grid axis over batch with dimension_semantics=("parallel",) so the second
    # TensorCore on v7x is used; at B=2 the whole problem stays gridless.
    out_pad = pl.pallas_call(
        kernel,
        out_shape=jax.ShapeDtypeStruct((B_pad, O_pad), jnp.float32),
        in_specs=[vmem] * len(kernel_inputs),
        out_specs=vmem,
        scratch_shapes=[
            pltpu.VMEM((T * B_pad, H), jnp.float32),  # single in-place sequence buffer
        ],
        # Scaling guard: whole-problem-in-VMEM design; keep well under the 64 MiB
        # physical VMEM on v7x (usage today is a few hundred KiB).
        compiler_params=pltpu.CompilerParams(vmem_limit_bytes=32 * 1024 * 1024),
    )(*kernel_inputs)

    return out_pad[:B, :O]


def lstm_model_reference(x, layer_params, fc_w, fc_b):
    """Pure-JAX reference matching torch.nn.LSTM(batch_first=True) + Linear."""
    B = x.shape[0]
    h_seq = x
    for (w_ih, w_hh, b_ih, b_hh) in layer_params:
        H = w_hh.shape[1]

        def step(carry, x_t, w_ih=w_ih, w_hh=w_hh, b_ih=b_ih, b_hh=b_hh, H=H):
            h, c = carry
            g = x_t @ w_ih.T + h @ w_hh.T + b_ih + b_hh
            i = jax.nn.sigmoid(g[:, 0 * H:1 * H])
            f = jax.nn.sigmoid(g[:, 1 * H:2 * H])
            gg = jnp.tanh(g[:, 2 * H:3 * H])
            o = jax.nn.sigmoid(g[:, 3 * H:4 * H])
            c = f * c + i * gg
            h = o * jnp.tanh(c)
            return (h, c), h

        init = (jnp.zeros((B, H), jnp.float32), jnp.zeros((B, H), jnp.float32))
        (_, _), hs = jax.lax.scan(step, init, jnp.swapaxes(h_seq, 0, 1))
        h_seq = jnp.swapaxes(hs, 0, 1)
    return h_seq[:, -1, :] @ fc_w.T + fc_b


def init_params(key, input_dim, hidden_dim, layer_dim, output_dim):
    """Deterministic init mirroring PyTorch's U(-1/sqrt(H), 1/sqrt(H)) shapes."""
    bound = 1.0 / sqrt(hidden_dim)
    layer_params = []
    for l in range(layer_dim):
        in_dim = input_dim if l == 0 else hidden_dim
        key, k1, k2, k3, k4 = jax.random.split(key, 5)
        w_ih = jax.random.uniform(k1, (4 * hidden_dim, in_dim), jnp.float32, -bound, bound)
        w_hh = jax.random.uniform(k2, (4 * hidden_dim, hidden_dim), jnp.float32, -bound, bound)
        b_ih = jax.random.uniform(k3, (4 * hidden_dim,), jnp.float32, -bound, bound)
        b_hh = jax.random.uniform(k4, (4 * hidden_dim,), jnp.float32, -bound, bound)
        layer_params.append((w_ih, w_hh, b_ih, b_hh))
    key, k5, k6 = jax.random.split(key, 3)
    fc_bound = 1.0 / sqrt(hidden_dim)
    fc_w = jax.random.uniform(k5, (output_dim, hidden_dim), jnp.float32, -fc_bound, fc_bound)
    fc_b = jax.random.uniform(k6, (output_dim,), jnp.float32, -fc_bound, fc_bound)
    return layer_params, fc_w, fc_b


if __name__ == "__main__":
    # Small shapes implied by the module: (batch, seq, input_dim) with
    # hidden_dim=32, layer_dim=2, output_dim=4.
    B, T, INPUT_DIM, HIDDEN_DIM, LAYER_DIM, OUTPUT_DIM = 2, 8, 16, 32, 2, 4

    key = jax.random.PRNGKey(0)
    key, kx = jax.random.split(key)
    x = jax.random.normal(kx, (B, T, INPUT_DIM), dtype=jnp.float32)

    layer_params, fc_w, fc_b = init_params(key, INPUT_DIM, HIDDEN_DIM, LAYER_DIM, OUTPUT_DIM)

    ref = jax.block_until_ready(lstm_model_reference(x, layer_params, fc_w, fc_b))

    # f32 MXU operands: exact (1e-5) parity with the f32 reference.
    out_f32 = jax.block_until_ready(
        lstm_model_forward(x, layer_params, fc_w, fc_b, matmul_dtype=jnp.float32))
    assert out_f32.shape == (B, OUTPUT_DIM)
    assert jnp.allclose(out_f32, ref, atol=1e-5, rtol=1e-5), (out_f32, ref)

    # bf16 MXU operands (single-pass MXU on v6e/v7x); elementwise gate math stays
    # f32, accumulation stays f32 — checked against the f32 reference at a
    # bf16-appropriate tolerance.
    out_bf16 = jax.block_until_ready(
        lstm_model_forward(x, layer_params, fc_w, fc_b, matmul_dtype=jnp.bfloat16))
    assert out_bf16.shape == (B, OUTPUT_DIM)
    assert jnp.allclose(out_bf16, ref, atol=5e-2, rtol=5e-2), (out_bf16, ref)

    print("KERNEL_OK")
</pallas_src>

<mosaic_0001>
module attributes {stable_mosaic.version = 11 : i64} {
  func.func @kernel(%arg0: memref<64x16xf32, #tpu.memory_space<vmem>>, %arg1: memref<16x128xf32, #tpu.memory_space<vmem>>, %arg2: memref<32x128xf32, #tpu.memory_space<vmem>>, %arg3: memref<1x128xf32, #tpu.memory_space<vmem>>, %arg4: memref<32x128xf32, #tpu.memory_space<vmem>>, %arg5: memref<32x128xf32, #tpu.memory_space<vmem>>, %arg6: memref<1x128xf32, #tpu.memory_space<vmem>>, %arg7: memref<32x128xf32, #tpu.memory_space<vmem>>, %arg8: memref<1x128xf32, #tpu.memory_space<vmem>>, %arg9: memref<8x128xf32, #tpu.memory_space<vmem>>, %arg10: memref<64x32xf32, #tpu.memory_space<vmem>>) attributes {dimension_semantics = [], scalar_prefetch = 0 : i64, scratch_operands = 1 : i64, tpu.core_type = #tpu.core_type<tc>} {
    %c0 = arith.constant 0 : index
    %c0_0 = arith.constant 0 : index
    %0 = vector.load %arg1[%c0, %c0_0] : memref<16x128xf32, #tpu.memory_space<vmem>>, vector<16x128xf32>
    %c0_1 = arith.constant 0 : index
    %c0_2 = arith.constant 0 : index
    %1 = vector.load %arg2[%c0_1, %c0_2] : memref<32x128xf32, #tpu.memory_space<vmem>>, vector<32x128xf32>
    %c0_3 = arith.constant 0 : index
    %c0_4 = arith.constant 0 : index
    %2 = vector.load %arg3[%c0_3, %c0_4] : memref<1x128xf32, #tpu.memory_space<vmem>>, vector<1x128xf32>
    %c0_5 = arith.constant 0 : index
    %c0_6 = arith.constant 0 : index
    %3 = vector.load %arg0[%c0_5, %c0_6] : memref<64x16xf32, #tpu.memory_space<vmem>>, vector<64x16xf32>
    %cst = arith.constant dense<0.000000e+00> : vector<64x128xf32>
    %4 = tpu.matmul %3, %0, %cst {dimension_numbers = #tpu.dot_dimension_numbers<[1], [0], [0], [1], [0, 0, 1, 1], [], []>} : vector<64x16xf32>, vector<16x128xf32>, vector<64x128xf32> -> vector<64x128xf32>
    %5 = vector.broadcast %2 : vector<1x128xf32> to vector<64x128xf32>
    %6 = arith.addf %4, %5 : vector<64x128xf32>
    %cst_7 = arith.constant 0.000000e+00 : f32
    %7 = vector.broadcast %cst_7 : f32 to vector<8x32xf32>
    %cst_8 = arith.constant 0.000000e+00 : f32
    %8 = vector.broadcast %cst_8 : f32 to vector<8x32xf32>
    %9 = vector.extract_strided_slice %6 {offsets = [0, 0], sizes = [8, 128], strides = [1, 1]} : vector<64x128xf32> to vector<8x128xf32>
    %cst_9 = arith.constant dense<0.000000e+00> : vector<8x128xf32>
    %10 = tpu.matmul %7, %1, %cst_9 {dimension_numbers = #tpu.dot_dimension_numbers<[1], [0], [0], [1], [0, 0, 1, 1], [], []>} : vector<8x32xf32>, vector<32x128xf32>, vector<8x128xf32> -> vector<8x128xf32>
    %11 = arith.addf %9, %10 : vector<8x128xf32>
    %12 = arith.negf %11 : vector<8x128xf32>
    %13 = math.exp %12 : vector<8x128xf32>
    %cst_10 = arith.constant 1.000000e+00 : f32
    %14 = vector.broadcast %cst_10 : f32 to vector<8x128xf32>
    %15 = arith.addf %14, %13 : vector<8x128xf32>
    %16 = arith.divf %14, %15 : vector<8x128xf32>
    %17 = math.tanh %11 : vector<8x128xf32>
    %18 = vector.extract_strided_slice %16 {offsets = [0, 0], sizes = [8, 32], strides = [1, 1]} : vector<8x128xf32> to vector<8x32xf32>
    %19 = vector.extract_strided_slice %16 {offsets = [0, 32], sizes = [8, 32], strides = [1, 1]} : vector<8x128xf32> to vector<8x32xf32>
    %20 = vector.extract_strided_slice %16 {offsets = [0, 96], sizes = [8, 32], strides = [1, 1]} : vector<8x128xf32> to vector<8x32xf32>
    %c64_i32 = arith.constant 64 : i32
    %21 = tpu.dynamic_rotate %17 by %c64_i32 dim 1 : vector<8x128xf32>, i32 -> vector<8x128xf32>
    %22 = vector.extract_strided_slice %21 {offsets = [0, 0], sizes = [8, 32], strides = [1, 1]} : vector<8x128xf32> to vector<8x32xf32>
    %23 = arith.mulf %19, %8 : vector<8x32xf32>
    %24 = arith.mulf %18, %22 : vector<8x32xf32>
    %25 = arith.addf %23, %24 : vector<8x32xf32>
    %26 = math.tanh %25 : vector<8x32xf32>
    %27 = arith.mulf %20, %26 : vector<8x32xf32>
    %c0_11 = arith.constant 0 : index
    %c0_12 = arith.constant 0 : index
    %28 = vector.load %arg10[%c0_11, %c0_12] : memref<64x32xf32, #tpu.memory_space<vmem>>, vector<8x32xf32>
    tpu.vector_store %arg10[%c0_11, %c0_12], %27 {strides = array<i32>} : memref<64x32xf32, #tpu.memory_space<vmem>>, vector<8x32xf32>,
    %29 = vector.extract_strided_slice %6 {offsets = [8, 0], sizes = [8, 128], strides = [1, 1]} : vector<64x128xf32> to vector<8x128xf32>
    %cst_13 = arith.constant dense<0.000000e+00> : vector<8x128xf32>
    %30 = tpu.matmul %27, %1, %cst_13 {dimension_numbers = #tpu.dot_dimension_numbers<[1], [0], [0], [1], [0, 0, 1, 1], [], []>} : vector<8x32xf32>, vector<32x128xf32>, vector<8x128xf32> -> vector<8x128xf32>
    %31 = arith.addf %29, %30 : vector<8x128xf32>
    %32 = arith.negf %31 : vector<8x128xf32>
    %33 = math.exp %32 : vector<8x128xf32>
    %cst_14 = arith.constant 1.000000e+00 : f32
    %34 = vector.broadcast %cst_14 : f32 to vector<8x128xf32>
    %35 = arith.addf %34, %33 : vector<8x128xf32>
    %36 = arith.divf %34, %35 : vector<8x128xf32>
    %37 = math.tanh %31 : vector<8x128xf32>
    %38 = vector.extract_strided_slice %36 {offsets = [0, 0], sizes = [8, 32], strides = [1, 1]} : vector<8x128xf32> to vector<8x32xf32>
    %39 = vector.extract_strided_slice %36 {offsets = [0, 32], sizes = [8, 32], strides = [1, 1]} : vector<8x128xf32> to vector<8x32xf32>
    %40 = vector.extract_strided_slice %36 {offsets = [0, 96], sizes = [8, 32], strides = [1, 1]} : vector<8x128xf32> to vector<8x32xf32>
    %c64_i32_15 = arith.constant 64 : i32
    %41 = tpu.dynamic_rotate %37 by %c64_i32_15 dim 1 : vector<8x128xf32>, i32 -> vector<8x128xf32>
    %42 = vector.extract_strided_slice %41 {offsets = [0, 0], sizes = [8, 32], strides = [1, 1]} : vector<8x128xf32> to vector<8x32xf32>
    %43 = arith.mulf %39, %25 : vector<8x32xf32>
    %44 = arith.mulf %38, %42 : vector<8x32xf32>
    %45 = arith.addf %43, %44 : vector<8x32xf32>
    %46 = math.tanh %45 : vector<8x32xf32>
    %47 = arith.mulf %40, %46 : vector<8x32xf32>
    %c8 = arith.constant 8 : index
    %c0_16 = arith.constant 0 : index
    %48 = vector.load %arg10[%c8, %c0_16] : memref<64x32xf32, #tpu.memory_space<vmem>>, vector<8x32xf32>
    tpu.vector_store %arg10[%c8, %c0_16], %47 {strides = array<i32>} : memref<64x32xf32, #tpu.memory_space<vmem>>, vector<8x32xf32>,
    %49 = vector.extract_strided_slice %6 {offsets = [16, 0], sizes = [8, 128], strides = [1, 1]} : vector<64x128xf32> to vector<8x128xf32>
    %cst_17 = arith.constant dense<0.000000e+00> : vector<8x128xf32>
    %50 = tpu.matmul %47, %1, %cst_17 {dimension_numbers = #tpu.dot_dimension_numbers<[1], [0], [0], [1], [0, 0, 1, 1], [], []>} : vector<8x32xf32>, vector<32x128xf32>, vector<8x128xf32> -> vector<8x128xf32>
    %51 = arith.addf %49, %50 : vector<8x128xf32>
    %52 = arith.negf %51 : vector<8x128xf32>
    %53 = math.exp %52 : vector<8x128xf32>
    %cst_18 = arith.constant 1.000000e+00 : f32
    %54 = vector.broadcast %cst_18 : f32 to vector<8x128xf32>
    %55 = arith.addf %54, %53 : vector<8x128xf32>
    %56 = arith.divf %54, %55 : vector<8x128xf32>
    %57 = math.tanh %51 : vector<8x128xf32>
    %58 = vector.extract_strided_slice %56 {offsets = [0, 0], sizes = [8, 32], strides = [1, 1]} : vector<8x128xf32> to vector<8x32xf32>
    %59 = vector.extract_strided_slice %56 {offsets = [0, 32], sizes = [8, 32], strides = [1, 1]} : vector<8x128xf32> to vector<8x32xf32>
    %60 = vector.extract_strided_slice %56 {offsets = [0, 96], sizes = [8, 32], strides = [1, 1]} : vector<8x128xf32> to vector<8x32xf32>
    %c64_i32_19 = arith.constant 64 : i32
    %61 = tpu.dynamic_rotate %57 by %c64_i32_19 dim 1 : vector<8x128xf32>, i32 -> vector<8x128xf32>
    %62 = vector.extract_strided_slice %61 {offsets = [0, 0], sizes = [8, 32], strides = [1, 1]} : vector<8x128xf32> to vector<8x32xf32>
    %63 = arith.mulf %59, %45 : vector<8x32xf32>
    %64 = arith.mulf %58, %62 : vector<8x32xf32>
    %65 = arith.addf %63, %64 : vector<8x32xf32>
    %66 = math.tanh %65 : vector<8x32xf32>
    %67 = arith.mulf %60, %66 : vector<8x32xf32>
    %c16 = arith.constant 16 : index
    %c0_20 = arith.constant 0 : index
    %68 = vector.load %arg10[%c16, %c0_20] : memref<64x32xf32, #tpu.memory_space<vmem>>, vector<8x32xf32>
    tpu.vector_store %arg10[%c16, %c0_20], %67 {strides = array<i32>} : memref<64x32xf32, #tpu.memory_space<vmem>>, vector<8x32xf32>,
    %69 = vector.extract_strided_slice %6 {offsets = [24, 0], sizes = [8, 128], strides = [1, 1]} : vector<64x128xf32> to vector<8x128xf32>
    %cst_21 = arith.constant dense<0.000000e+00> : vector<8x128xf32>
    %70 = tpu.matmul %67, %1, %cst_21 {dimension_numbers = #tpu.dot_dimension_numbers<[1], [0], [0], [1], [0, 0, 1, 1], [], []>} : vector<8x32xf32>, vector<32x128xf32>, vector<8x128xf32> -> vector<8x128xf32>
    %71 = arith.addf %69, %70 : vector<8x128xf32>
    %72 = arith.negf %71 : vector<8x128xf32>
    %73 = math.exp %72 : vector<8x128xf32>
    %cst_22 = arith.constant 1.000000e+00 : f32
    %74 = vector.broadcast %cst_22 : f32 to vector<8x128xf32>
    %75 = arith.addf %74, %73 : vector<8x128xf32>
    %76 = arith.divf %74, %75 : vector<8x128xf32>
    %77 = math.tanh %71 : vector<8x128xf32>
    %78 = vector.extract_strided_slice %76 {offsets = [0, 0], sizes = [8, 32], strides = [1, 1]} : vector<8x128xf32> to vector<8x32xf32>
    %79 = vector.extract_strided_slice %76 {offsets = [0, 32], sizes = [8, 32], strides = [1, 1]} : vector<8x128xf32> to vector<8x32xf32>
    %80 = vector.extract_strided_slice %76 {offsets = [0, 96], sizes = [8, 32], strides = [1, 1]} : vector<8x128xf32> to vector<8x32xf32>
    %c64_i32_23 = arith.constant 64 : i32
    %81 = tpu.dynamic_rotate %77 by %c64_i32_23 dim 1 : vector<8x128xf32>, i32 -> vector<8x128xf32>
    %82 = vector.extract_strided_slice %81 {offsets = [0, 0], sizes = [8, 32], strides = [1, 1]} : vector<8x128xf32> to vector<8x32xf32>
    %83 = arith.mulf %79, %65 : vector<8x32xf32>
    %84 = arith.mulf %78, %82 : vector<8x32xf32>
    %85 = arith.addf %83, %84 : vector<8x32xf32>
    %86 = math.tanh %85 : vector<8x32xf32>
    %87 = arith.mulf %80, %86 : vector<8x32xf32>
    %c24 = arith.constant 24 : index
    %c0_24 = arith.constant 0 : index
    %88 = vector.load %arg10[%c24, %c0_24] : memref<64x32xf32, #tpu.memory_space<vmem>>, vector<8x32xf32>
    tpu.vector_store %arg10[%c24, %c0_24], %87 {strides = array<i32>} : memref<64x32xf32, #tpu.memory_space<vmem>>, vector<8x32xf32>,
    %89 = vector.extract_strided_slice %6 {offsets = [32, 0], sizes = [8, 128], strides = [1, 1]} : vector<64x128xf32> to vector<8x128xf32>
    %cst_25 = arith.constant dense<0.000000e+00> : vector<8x128xf32>
    %90 = tpu.matmul %87, %1, %cst_25 {dimension_numbers = #tpu.dot_dimension_numbers<[1], [0], [0], [1], [0, 0, 1, 1], [], []>} : vector<8x32xf32>, vector<32x128xf32>, vector<8x128xf32> -> vector<8x128xf32>
    %91 = arith.addf %89, %90 : vector<8x128xf32>
    %92 = arith.negf %91 : vector<8x128xf32>
    %93 = math.exp %92 : vector<8x128xf32>
    %cst_26 = arith.constant 1.000000e+00 : f32
    %94 = vector.broadcast %cst_26 : f32 to vector<8x128xf32>
    %95 = arith.addf %94, %93 : vector<8x128xf32>
    %96 = arith.divf %94, %95 : vector<8x128xf32>
    %97 = math.tanh %91 : vector<8x128xf32>
    %98 = vector.extract_strided_slice %96 {offsets = [0, 0], sizes = [8, 32], strides = [1, 1]} : vector<8x128xf32> to vector<8x32xf32>
    %99 = vector.extract_strided_slice %96 {offsets = [0, 32], sizes = [8, 32], strides = [1, 1]} : vector<8x128xf32> to vector<8x32xf32>
    %100 = vector.extract_strided_slice %96 {offsets = [0, 96], sizes = [8, 32], strides = [1, 1]} : vector<8x128xf32> to vector<8x32xf32>
    %c64_i32_27 = arith.constant 64 : i32
    %101 = tpu.dynamic_rotate %97 by %c64_i32_27 dim 1 : vector<8x128xf32>, i32 -> vector<8x128xf32>
    %102 = vector.extract_strided_slice %101 {offsets = [0, 0], sizes = [8, 32], strides = [1, 1]} : vector<8x128xf32> to vector<8x32xf32>
    %103 = arith.mulf %99, %85 : vector<8x32xf32>
    %104 = arith.mulf %98, %102 : vector<8x32xf32>
    %105 = arith.addf %103, %104 : vector<8x32xf32>
    %106 = math.tanh %105 : vector<8x32xf32>
    %107 = arith.mulf %100, %106 : vector<8x32xf32>
    %c32 = arith.constant 32 : index
    %c0_28 = arith.constant 0 : index
    %108 = vector.load %arg10[%c32, %c0_28] : memref<64x32xf32, #tpu.memory_space<vmem>>, vector<8x32xf32>
    tpu.vector_store %arg10[%c32, %c0_28], %107 {strides = array<i32>} : memref<64x32xf32, #tpu.memory_space<vmem>>, vector<8x32xf32>,
    %109 = vector.extract_strided_slice %6 {offsets = [40, 0], sizes = [8, 128], strides = [1, 1]} : vector<64x128xf32> to vector<8x128xf32>
    %cst_29 = arith.constant dense<0.000000e+00> : vector<8x128xf32>
    %110 = tpu.matmul %107, %1, %cst_29 {dimension_numbers = #tpu.dot_dimension_numbers<[1], [0], [0], [1], [0, 0, 1, 1], [], []>} : vector<8x32xf32>, vector<32x128xf32>, vector<8x128xf32> -> vector<8x128xf32>
    %111 = arith.addf %109, %110 : vector<8x128xf32>
    %112 = arith.negf %111 : vector<8x128xf32>
    %113 = math.exp %112 : vector<8x128xf32>
    %cst_30 = arith.constant 1.000000e+00 : f32
    %114 = vector.broadcast %cst_30 : f32 to vector<8x128xf32>
    %115 = arith.addf %114, %113 : vector<8x128xf32>
    %116 = arith.divf %114, %115 : vector<8x128xf32>
    %117 = math.tanh %111 : vector<8x128xf32>
    %118 = vector.extract_strided_slice %116 {offsets = [0, 0], sizes = [8, 32], strides = [1, 1]} : vector<8x128xf32> to vector<8x32xf32>
    %119 = vector.extract_strided_slice %116 {offsets = [0, 32], sizes = [8, 32], strides = [1, 1]} : vector<8x128xf32> to vector<8x32xf32>
    %120 = vector.extract_strided_slice %116 {offsets = [0, 96], sizes = [8, 32], strides = [1, 1]} : vector<8x128xf32> to vector<8x32xf32>
    %c64_i32_31 = arith.constant 64 : i32
    %121 = tpu.dynamic_rotate %117 by %c64_i32_31 dim 1 : vector<8x128xf32>, i32 -> vector<8x128xf32>
    %122 = vector.extract_strided_slice %121 {offsets = [0, 0], sizes = [8, 32], strides = [1, 1]} : vector<8x128xf32> to vector<8x32xf32>
    %123 = arith.mulf %119, %105 : vector<8x32xf32>
    %124 = arith.mulf %118, %122 : vector<8x32xf32>
    %125 = arith.addf %123, %124 : vector<8x32xf32>
    %126 = math.tanh %125 : vector<8x32xf32>
    %127 = arith.mulf %120, %126 : vector<8x32xf32>
    %c40 = arith.constant 40 : index
    %c0_32 = arith.constant 0 : index
    %128 = vector.load %arg10[%c40, %c0_32] : memref<64x32xf32, #tpu.memory_space<vmem>>, vector<8x32xf32>
    tpu.vector_store %arg10[%c40, %c0_32], %127 {strides = array<i32>} : memref<64x32xf32, #tpu.memory_space<vmem>>, vector<8x32xf32>,
    %129 = vector.extract_strided_slice %6 {offsets = [48, 0], sizes = [8, 128], strides = [1, 1]} : vector<64x128xf32> to vector<8x128xf32>
    %cst_33 = arith.constant dense<0.000000e+00> : vector<8x128xf32>
    %130 = tpu.matmul %127, %1, %cst_33 {dimension_numbers = #tpu.dot_dimension_numbers<[1], [0], [0], [1], [0, 0, 1, 1], [], []>} : vector<8x32xf32>, vector<32x128xf32>, vector<8x128xf32> -> vector<8x128xf32>
    %131 = arith.addf %129, %130 : vector<8x128xf32>
    %132 = arith.negf %131 : vector<8x128xf32>
    %133 = math.exp %132 : vector<8x128xf32>
    %cst_34 = arith.constant 1.000000e+00 : f32
    %134 = vector.broadcast %cst_34 : f32 to vector<8x128xf32>
    %135 = arith.addf %134, %133 : vector<8x128xf32>
    %136 = arith.divf %134, %135 : vector<8x128xf32>
    %137 = math.tanh %131 : vector<8x128xf32>
    %138 = vector.extract_strided_slice %136 {offsets = [0, 0], sizes = [8, 32], strides = [1, 1]} : vector<8x128xf32> to vector<8x32xf32>
    %139 = vector.extract_strided_slice %136 {offsets = [0, 32], sizes = [8, 32], strides = [1, 1]} : vector<8x128xf32> to vector<8x32xf32>
    %140 = vector.extract_strided_slice %136 {offsets = [0, 96], sizes = [8, 32], strides = [1, 1]} : vector<8x128xf32> to vector<8x32xf32>
    %c64_i32_35 = arith.constant 64 : i32
    %141 = tpu.dynamic_rotate %137 by %c64_i32_35 dim 1 : vector<8x128xf32>, i32 -> vector<8x128xf32>
    %142 = vector.extract_strided_slice %141 {offsets = [0, 0], sizes = [8, 32], strides = [1, 1]} : vector<8x128xf32> to vector<8x32xf32>
    %143 = arith.mulf %139, %125 : vector<8x32xf32>
    %144 = arith.mulf %138, %142 : vector<8x32xf32>
    %145 = arith.addf %143, %144 : vector<8x32xf32>
    %146 = math.tanh %145 : vector<8x32xf32>
    %147 = arith.mulf %140, %146 : vector<8x32xf32>
    %c48 = arith.constant 48 : index
    %c0_36 = arith.constant 0 : index
    %148 = vector.load %arg10[%c48, %c0_36] : memref<64x32xf32, #tpu.memory_space<vmem>>, vector<8x32xf32>
    tpu.vector_store %arg10[%c48, %c0_36], %147 {strides = array<i32>} : memref<64x32xf32, #tpu.memory_space<vmem>>, vector<8x32xf32>,
    %149 = vector.extract_strided_slice %6 {offsets = [56, 0], sizes = [8, 128], strides = [1, 1]} : vector<64x128xf32> to vector<8x128xf32>
    %cst_37 = arith.constant dense<0.000000e+00> : vector<8x128xf32>
    %150 = tpu.matmul %147, %1, %cst_37 {dimension_numbers = #tpu.dot_dimension_numbers<[1], [0], [0], [1], [0, 0, 1, 1], [], []>} : vector<8x32xf32>, vector<32x128xf32>, vector<8x128xf32> -> vector<8x128xf32>
    %151 = arith.addf %149, %150 : vector<8x128xf32>
    %152 = arith.negf %151 : vector<8x128xf32>
    %153 = math.exp %152 : vector<8x128xf32>
    %cst_38 = arith.constant 1.000000e+00 : f32
    %154 = vector.broadcast %cst_38 : f32 to vector<8x128xf32>
    %155 = arith.addf %154, %153 : vector<8x128xf32>
    %156 = arith.divf %154, %155 : vector<8x128xf32>
    %157 = math.tanh %151 : vector<8x128xf32>
    %158 = vector.extract_strided_slice %156 {offsets = [0, 0], sizes = [8, 32], strides = [1, 1]} : vector<8x128xf32> to vector<8x32xf32>
    %159 = vector.extract_strided_slice %156 {offsets = [0, 32], sizes = [8, 32], strides = [1, 1]} : vector<8x128xf32> to vector<8x32xf32>
    %160 = vector.extract_strided_slice %156 {offsets = [0, 96], sizes = [8, 32], strides = [1, 1]} : vector<8x128xf32> to vector<8x32xf32>
    %c64_i32_39 = arith.constant 64 : i32
    %161 = tpu.dynamic_rotate %157 by %c64_i32_39 dim 1 : vector<8x128xf32>, i32 -> vector<8x128xf32>
    %162 = vector.extract_strided_slice %161 {offsets = [0, 0], sizes = [8, 32], strides = [1, 1]} : vector<8x128xf32> to vector<8x32xf32>
    %163 = arith.mulf %159, %145 : vector<8x32xf32>
    %164 = arith.mulf %158, %162 : vector<8x32xf32>
    %165 = arith.addf %163, %164 : vector<8x32xf32>
    %166 = math.tanh %165 : vector<8x32xf32>
    %167 = arith.mulf %160, %166 : vector<8x32xf32>
    %c56 = arith.constant 56 : index
    %c0_40 = arith.constant 0 : index
    %168 = vector.load %arg10[%c56, %c0_40] : memref<64x32xf32, #tpu.memory_space<vmem>>, vector<8x32xf32>
    tpu.vector_store %arg10[%c56, %c0_40], %167 {strides = array<i32>} : memref<64x32xf32, #tpu.memory_space<vmem>>, vector<8x32xf32>,
    %c0_41 = arith.constant 0 : index
    %c0_42 = arith.constant 0 : index
    %169 = vector.load %arg4[%c0_41, %c0_42] : memref<32x128xf32, #tpu.memory_space<vmem>>, vector<32x128xf32>
    %c0_43 = arith.constant 0 : index
    %c0_44 = arith.constant 0 : index
    %170 = vector.load %arg5[%c0_43, %c0_44] : memref<32x128xf32, #tpu.memory_space<vmem>>, vector<32x128xf32>
    %c0_45 = arith.constant 0 : index
    %c0_46 = arith.constant 0 : index
    %171 = vector.load %arg6[%c0_45, %c0_46] : memref<1x128xf32, #tpu.memory_space<vmem>>, vector<1x128xf32>
    %c0_47 = arith.constant 0 : index
    %c0_48 = arith.constant 0 : index
    %172 = vector.load %arg10[%c0_47, %c0_48] : memref<64x32xf32, #tpu.memory_space<vmem>>, vector<64x32xf32>
    %cst_49 = arith.constant dense<0.000000e+00> : vector<64x128xf32>
    %173 = tpu.matmul %172, %169, %cst_49 {dimension_numbers = #tpu.dot_dimension_numbers<[1], [0], [0], [1], [0, 0, 1, 1], [], []>} : vector<64x32xf32>, vector<32x128xf32>, vector<64x128xf32> -> vector<64x128xf32>
    %174 = vector.broadcast %171 : vector<1x128xf32> to vector<64x128xf32>
    %175 = arith.addf %173, %174 : vector<64x128xf32>
    %cst_50 = arith.constant 0.000000e+00 : f32
    %176 = vector.broadcast %cst_50 : f32 to vector<8x32xf32>
    %cst_51 = arith.constant 0.000000e+00 : f32
    %177 = vector.broadcast %cst_51 : f32 to vector<8x32xf32>
    %178 = vector.extract_strided_slice %175 {offsets = [0, 0], sizes = [8, 128], strides = [1, 1]} : vector<64x128xf32> to vector<8x128xf32>
    %cst_52 = arith.constant dense<0.000000e+00> : vector<8x128xf32>
    %179 = tpu.matmul %176, %170, %cst_52 {dimension_numbers = #tpu.dot_dimension_numbers<[1], [0], [0], [1], [0, 0, 1, 1], [], []>} : vector<8x32xf32>, vector<32x128xf32>, vector<8x128xf32> -> vector<8x128xf32>
    %180 = arith.addf %178, %179 : vector<8x128xf32>
    %181 = arith.negf %180 : vector<8x128xf32>
    %182 = math.exp %181 : vector<8x128xf32>
    %cst_53 = arith.constant 1.000000e+00 : f32
    %183 = vector.broadcast %cst_53 : f32 to vector<8x128xf32>
    %184 = arith.addf %183, %182 : vector<8x128xf32>
    %185 = arith.divf %183, %184 : vector<8x128xf32>
    %186 = math.tanh %180 : vector<8x128xf32>
    %187 = vector.extract_strided_slice %185 {offsets = [0, 0], sizes = [8, 32], strides = [1, 1]} : vector<8x128xf32> to vector<8x32xf32>
    %188 = vector.extract_strided_slice %185 {offsets = [0, 32], sizes = [8, 32], strides = [1, 1]} : vector<8x128xf32> to vector<8x32xf32>
    %189 = vector.extract_strided_slice %185 {offsets = [0, 96], sizes = [8, 32], strides = [1, 1]} : vector<8x128xf32> to vector<8x32xf32>
    %c64_i32_54 = arith.constant 64 : i32
    %190 = tpu.dynamic_rotate %186 by %c64_i32_54 dim 1 : vector<8x128xf32>, i32 -> vector<8x128xf32>
    %191 = vector.extract_strided_slice %190 {offsets = [0, 0], sizes = [8, 32], strides = [1, 1]} : vector<8x128xf32> to vector<8x32xf32>
    %192 = arith.mulf %188, %177 : vector<8x32xf32>
    %193 = arith.mulf %187, %191 : vector<8x32xf32>
    %194 = arith.addf %192, %193 : vector<8x32xf32>
    %195 = math.tanh %194 : vector<8x32xf32>
    %196 = arith.mulf %189, %195 : vector<8x32xf32>
    %197 = vector.extract_strided_slice %175 {offsets = [8, 0], sizes = [8, 128], strides = [1, 1]} : vector<64x128xf32> to vector<8x128xf32>
    %cst_55 = arith.constant dense<0.000000e+00> : vector<8x128xf32>
    %198 = tpu.matmul %196, %170, %cst_55 {dimension_numbers = #tpu.dot_dimension_numbers<[1], [0], [0], [1], [0, 0, 1, 1], [], []>} : vector<8x32xf32>, vector<32x128xf32>, vector<8x128xf32> -> vector<8x128xf32>
    %199 = arith.addf %197, %198 : vector<8x128xf32>
    %200 = arith.negf %199 : vector<8x128xf32>
    %201 = math.exp %200 : vector<8x128xf32>
    %cst_56 = arith.constant 1.000000e+00 : f32
    %202 = vector.broadcast %cst_56 : f32 to vector<8x128xf32>
    %203 = arith.addf %202, %201 : vector<8x128xf32>
    %204 = arith.divf %202, %203 : vector<8x128xf32>
    %205 = math.tanh %199 : vector<8x128xf32>
    %206 = vector.extract_strided_slice %204 {offsets = [0, 0], sizes = [8, 32], strides = [1, 1]} : vector<8x128xf32> to vector<8x32xf32>
    %207 = vector.extract_strided_slice %204 {offsets = [0, 32], sizes = [8, 32], strides = [1, 1]} : vector<8x128xf32> to vector<8x32xf32>
    %208 = vector.extract_strided_slice %204 {offsets = [0, 96], sizes = [8, 32], strides = [1, 1]} : vector<8x128xf32> to vector<8x32xf32>
    %c64_i32_57 = arith.constant 64 : i32
    %209 = tpu.dynamic_rotate %205 by %c64_i32_57 dim 1 : vector<8x128xf32>, i32 -> vector<8x128xf32>
    %210 = vector.extract_strided_slice %209 {offsets = [0, 0], sizes = [8, 32], strides = [1, 1]} : vector<8x128xf32> to vector<8x32xf32>
    %211 = arith.mulf %207, %194 : vector<8x32xf32>
    %212 = arith.mulf %206, %210 : vector<8x32xf32>
    %213 = arith.addf %211, %212 : vector<8x32xf32>
    %214 = math.tanh %213 : vector<8x32xf32>
    %215 = arith.mulf %208, %214 : vector<8x32xf32>
    %216 = vector.extract_strided_slice %175 {offsets = [16, 0], sizes = [8, 128], strides = [1, 1]} : vector<64x128xf32> to vector<8x128xf32>
    %cst_58 = arith.constant dense<0.000000e+00> : vector<8x128xf32>
    %217 = tpu.matmul %215, %170, %cst_58 {dimension_numbers = #tpu.dot_dimension_numbers<[1], [0], [0], [1], [0, 0, 1, 1], [], []>} : vector<8x32xf32>, vector<32x128xf32>, vector<8x128xf32> -> vector<8x128xf32>
    %218 = arith.addf %216, %217 : vector<8x128xf32>
    %219 = arith.negf %218 : vector<8x128xf32>
    %220 = math.exp %219 : vector<8x128xf32>
    %cst_59 = arith.constant 1.000000e+00 : f32
    %221 = vector.broadcast %cst_59 : f32 to vector<8x128xf32>
    %222 = arith.addf %221, %220 : vector<8x128xf32>
    %223 = arith.divf %221, %222 : vector<8x128xf32>
    %224 = math.tanh %218 : vector<8x128xf32>
    %225 = vector.extract_strided_slice %223 {offsets = [0, 0], sizes = [8, 32], strides = [1, 1]} : vector<8x128xf32> to vector<8x32xf32>
    %226 = vector.extract_strided_slice %223 {offsets = [0, 32], sizes = [8, 32], strides = [1, 1]} : vector<8x128xf32> to vector<8x32xf32>
    %227 = vector.extract_strided_slice %223 {offsets = [0, 96], sizes = [8, 32], strides = [1, 1]} : vector<8x128xf32> to vector<8x32xf32>
    %c64_i32_60 = arith.constant 64 : i32
    %228 = tpu.dynamic_rotate %224 by %c64_i32_60 dim 1 : vector<8x128xf32>, i32 -> vector<8x128xf32>
    %229 = vector.extract_strided_slice %228 {offsets = [0, 0], sizes = [8, 32], strides = [1, 1]} : vector<8x128xf32> to vector<8x32xf32>
    %230 = arith.mulf %226, %213 : vector<8x32xf32>
    %231 = arith.mulf %225, %229 : vector<8x32xf32>
    %232 = arith.addf %230, %231 : vector<8x32xf32>
    %233 = math.tanh %232 : vector<8x32xf32>
    %234 = arith.mulf %227, %233 : vector<8x32xf32>
    %235 = vector.extract_strided_slice %175 {offsets = [24, 0], sizes = [8, 128], strides = [1, 1]} : vector<64x128xf32> to vector<8x128xf32>
    %cst_61 = arith.constant dense<0.000000e+00> : vector<8x128xf32>
    %236 = tpu.matmul %234, %170, %cst_61 {dimension_numbers = #tpu.dot_dimension_numbers<[1], [0], [0], [1], [0, 0, 1, 1], [], []>} : vector<8x32xf32>, vector<32x128xf32>, vector<8x128xf32> -> vector<8x128xf32>
    %237 = arith.addf %235, %236 : vector<8x128xf32>
    %238 = arith.negf %237 : vector<8x128xf32>
    %239 = math.exp %238 : vector<8x128xf32>
    %cst_62 = arith.constant 1.000000e+00 : f32
    %240 = vector.broadcast %cst_62 : f32 to vector<8x128xf32>
    %241 = arith.addf %240, %239 : vector<8x128xf32>
    %242 = arith.divf %240, %241 : vector<8x128xf32>
    %243 = math.tanh %237 : vector<8x128xf32>
    %244 = vector.extract_strided_slice %242 {offsets = [0, 0], sizes = [8, 32], strides = [1, 1]} : vector<8x128xf32> to vector<8x32xf32>
    %245 = vector.extract_strided_slice %242 {offsets = [0, 32], sizes = [8, 32], strides = [1, 1]} : vector<8x128xf32> to vector<8x32xf32>
    %246 = vector.extract_strided_slice %242 {offsets = [0, 96], sizes = [8, 32], strides = [1, 1]} : vector<8x128xf32> to vector<8x32xf32>
    %c64_i32_63 = arith.constant 64 : i32
    %247 = tpu.dynamic_rotate %243 by %c64_i32_63 dim 1 : vector<8x128xf32>, i32 -> vector<8x128xf32>
    %248 = vector.extract_strided_slice %247 {offsets = [0, 0], sizes = [8, 32], strides = [1, 1]} : vector<8x128xf32> to vector<8x32xf32>
    %249 = arith.mulf %245, %232 : vector<8x32xf32>
    %250 = arith.mulf %244, %248 : vector<8x32xf32>
    %251 = arith.addf %249, %250 : vector<8x32xf32>
    %252 = math.tanh %251 : vector<8x32xf32>
    %253 = arith.mulf %246, %252 : vector<8x32xf32>
    %254 = vector.extract_strided_slice %175 {offsets = [32, 0], sizes = [8, 128], strides = [1, 1]} : vector<64x128xf32> to vector<8x128xf32>
    %cst_64 = arith.constant dense<0.000000e+00> : vector<8x128xf32>
    %255 = tpu.matmul %253, %170, %cst_64 {dimension_numbers = #tpu.dot_dimension_numbers<[1], [0], [0], [1], [0, 0, 1, 1], [], []>} : vector<8x32xf32>, vector<32x128xf32>, vector<8x128xf32> -> vector<8x128xf32>
    %256 = arith.addf %254, %255 : vector<8x128xf32>
    %257 = arith.negf %256 : vector<8x128xf32>
    %258 = math.exp %257 : vector<8x128xf32>
    %cst_65 = arith.constant 1.000000e+00 : f32
    %259 = vector.broadcast %cst_65 : f32 to vector<8x128xf32>
    %260 = arith.addf %259, %258 : vector<8x128xf32>
    %261 = arith.divf %259, %260 : vector<8x128xf32>
    %262 = math.tanh %256 : vector<8x128xf32>
    %263 = vector.extract_strided_slice %261 {offsets = [0, 0], sizes = [8, 32], strides = [1, 1]} : vector<8x128xf32> to vector<8x32xf32>
    %264 = vector.extract_strided_slice %261 {offsets = [0, 32], sizes = [8, 32], strides = [1, 1]} : vector<8x128xf32> to vector<8x32xf32>
    %265 = vector.extract_strided_slice %261 {offsets = [0, 96], sizes = [8, 32], strides = [1, 1]} : vector<8x128xf32> to vector<8x32xf32>
    %c64_i32_66 = arith.constant 64 : i32
    %266 = tpu.dynamic_rotate %262 by %c64_i32_66 dim 1 : vector<8x128xf32>, i32 -> vector<8x128xf32>
    %267 = vector.extract_strided_slice %266 {offsets = [0, 0], sizes = [8, 32], strides = [1, 1]} : vector<8x128xf32> to vector<8x32xf32>
    %268 = arith.mulf %264, %251 : vector<8x32xf32>
    %269 = arith.mulf %263, %267 : vector<8x32xf32>
    %270 = arith.addf %268, %269 : vector<8x32xf32>
    %271 = math.tanh %270 : vector<8x32xf32>
    %272 = arith.mulf %265, %271 : vector<8x32xf32>
    %273 = vector.extract_strided_slice %175 {offsets = [40, 0], sizes = [8, 128], strides = [1, 1]} : vector<64x128xf32> to vector<8x128xf32>
    %cst_67 = arith.constant dense<0.000000e+00> : vector<8x128xf32>
    %274 = tpu.matmul %272, %170, %cst_67 {dimension_numbers = #tpu.dot_dimension_numbers<[1], [0], [0], [1], [0, 0, 1, 1], [], []>} : vector<8x32xf32>, vector<32x128xf32>, vector<8x128xf32> -> vector<8x128xf32>
    %275 = arith.addf %273, %274 : vector<8x128xf32>
    %276 = arith.negf %275 : vector<8x128xf32>
    %277 = math.exp %276 : vector<8x128xf32>
    %cst_68 = arith.constant 1.000000e+00 : f32
    %278 = vector.broadcast %cst_68 : f32 to vector<8x128xf32>
    %279 = arith.addf %278, %277 : vector<8x128xf32>
    %280 = arith.divf %278, %279 : vector<8x128xf32>
    %281 = math.tanh %275 : vector<8x128xf32>
    %282 = vector.extract_strided_slice %280 {offsets = [0, 0], sizes = [8, 32], strides = [1, 1]} : vector<8x128xf32> to vector<8x32xf32>
    %283 = vector.extract_strided_slice %280 {offsets = [0, 32], sizes = [8, 32], strides = [1, 1]} : vector<8x128xf32> to vector<8x32xf32>
    %284 = vector.extract_strided_slice %280 {offsets = [0, 96], sizes = [8, 32], strides = [1, 1]} : vector<8x128xf32> to vector<8x32xf32>
    %c64_i32_69 = arith.constant 64 : i32
    %285 = tpu.dynamic_rotate %281 by %c64_i32_69 dim 1 : vector<8x128xf32>, i32 -> vector<8x128xf32>
    %286 = vector.extract_strided_slice %285 {offsets = [0, 0], sizes = [8, 32], strides = [1, 1]} : vector<8x128xf32> to vector<8x32xf32>
    %287 = arith.mulf %283, %270 : vector<8x32xf32>
    %288 = arith.mulf %282, %286 : vector<8x32xf32>
    %289 = arith.addf %287, %288 : vector<8x32xf32>
    %290 = math.tanh %289 : vector<8x32xf32>
    %291 = arith.mulf %284, %290 : vector<8x32xf32>
    %292 = vector.extract_strided_slice %175 {offsets = [48, 0], sizes = [8, 128], strides = [1, 1]} : vector<64x128xf32> to vector<8x128xf32>
    %cst_70 = arith.constant dense<0.000000e+00> : vector<8x128xf32>
    %293 = tpu.matmul %291, %170, %cst_70 {dimension_numbers = #tpu.dot_dimension_numbers<[1], [0], [0], [1], [0, 0, 1, 1], [], []>} : vector<8x32xf32>, vector<32x128xf32>, vector<8x128xf32> -> vector<8x128xf32>
    %294 = arith.addf %292, %293 : vector<8x128xf32>
    %295 = arith.negf %294 : vector<8x128xf32>
    %296 = math.exp %295 : vector<8x128xf32>
    %cst_71 = arith.constant 1.000000e+00 : f32
    %297 = vector.broadcast %cst_71 : f32 to vector<8x128xf32>
    %298 = arith.addf %297, %296 : vector<8x128xf32>
    %299 = arith.divf %297, %298 : vector<8x128xf32>
    %300 = math.tanh %294 : vector<8x128xf32>
    %301 = vector.extract_strided_slice %299 {offsets = [0, 0], sizes = [8, 32], strides = [1, 1]} : vector<8x128xf32> to vector<8x32xf32>
    %302 = vector.extract_strided_slice %299 {offsets = [0, 32], sizes = [8, 32], strides = [1, 1]} : vector<8x128xf32> to vector<8x32xf32>
    %303 = vector.extract_strided_slice %299 {offsets = [0, 96], sizes = [8, 32], strides = [1, 1]} : vector<8x128xf32> to vector<8x32xf32>
    %c64_i32_72 = arith.constant 64 : i32
    %304 = tpu.dynamic_rotate %300 by %c64_i32_72 dim 1 : vector<8x128xf32>, i32 -> vector<8x128xf32>
    %305 = vector.extract_strided_slice %304 {offsets = [0, 0], sizes = [8, 32], strides = [1, 1]} : vector<8x128xf32> to vector<8x32xf32>
    %306 = arith.mulf %302, %289 : vector<8x32xf32>
    %307 = arith.mulf %301, %305 : vector<8x32xf32>
    %308 = arith.addf %306, %307 : vector<8x32xf32>
    %309 = math.tanh %308 : vector<8x32xf32>
    %310 = arith.mulf %303, %309 : vector<8x32xf32>
    %311 = vector.extract_strided_slice %175 {offsets = [56, 0], sizes = [8, 128], strides = [1, 1]} : vector<64x128xf32> to vector<8x128xf32>
    %cst_73 = arith.constant dense<0.000000e+00> : vector<8x128xf32>
    %312 = tpu.matmul %310, %170, %cst_73 {dimension_numbers = #tpu.dot_dimension_numbers<[1], [0], [0], [1], [0, 0, 1, 1], [], []>} : vector<8x32xf32>, vector<32x128xf32>, vector<8x128xf32> -> vector<8x128xf32>
    %313 = arith.addf %311, %312 : vector<8x128xf32>
    %314 = arith.negf %313 : vector<8x128xf32>
    %315 = math.exp %314 : vector<8x128xf32>
    %cst_74 = arith.constant 1.000000e+00 : f32
    %316 = vector.broadcast %cst_74 : f32 to vector<8x128xf32>
    %317 = arith.addf %316, %315 : vector<8x128xf32>
    %318 = arith.divf %316, %317 : vector<8x128xf32>
    %319 = math.tanh %313 : vector<8x128xf32>
    %320 = vector.extract_strided_slice %318 {offsets = [0, 0], sizes = [8, 32], strides = [1, 1]} : vector<8x128xf32> to vector<8x32xf32>
    %321 = vector.extract_strided_slice %318 {offsets = [0, 32], sizes = [8, 32], strides = [1, 1]} : vector<8x128xf32> to vector<8x32xf32>
    %322 = vector.extract_strided_slice %318 {offsets = [0, 96], sizes = [8, 32], strides = [1, 1]} : vector<8x128xf32> to vector<8x32xf32>
    %c64_i32_75 = arith.constant 64 : i32
    %323 = tpu.dynamic_rotate %319 by %c64_i32_75 dim 1 : vector<8x128xf32>, i32 -> vector<8x128xf32>
    %324 = vector.extract_strided_slice %323 {offsets = [0, 0], sizes = [8, 32], strides = [1, 1]} : vector<8x128xf32> to vector<8x32xf32>
    %325 = arith.mulf %321, %308 : vector<8x32xf32>
    %326 = arith.mulf %320, %324 : vector<8x32xf32>
    %327 = arith.addf %325, %326 : vector<8x32xf32>
    %328 = math.tanh %327 : vector<8x32xf32>
    %329 = arith.mulf %322, %328 : vector<8x32xf32>
    %c0_76 = arith.constant 0 : index
    %c0_77 = arith.constant 0 : index
    %330 = vector.load %arg7[%c0_76, %c0_77] : memref<32x128xf32, #tpu.memory_space<vmem>>, vector<32x128xf32>
    %cst_78 = arith.constant dense<0.000000e+00> : vector<8x128xf32>
    %331 = tpu.matmul %329, %330, %cst_78 {dimension_numbers = #tpu.dot_dimension_numbers<[1], [0], [0], [1], [0, 0, 1, 1], [], []>} : vector<8x32xf32>, vector<32x128xf32>, vector<8x128xf32> -> vector<8x128xf32>
    %c0_79 = arith.constant 0 : index
    %c0_80 = arith.constant 0 : index
    %332 = vector.load %arg8[%c0_79, %c0_80] : memref<1x128xf32, #tpu.memory_space<vmem>>, vector<1x128xf32>
    %333 = vector.broadcast %332 : vector<1x128xf32> to vector<8x128xf32>
    %334 = arith.addf %331, %333 : vector<8x128xf32>
    %c0_81 = arith.constant 0 : index
    %c0_82 = arith.constant 0 : index
    %335 = vector.load %arg9[%c0_81, %c0_82] : memref<8x128xf32, #tpu.memory_space<vmem>>, vector<8x128xf32>
    tpu.vector_store %arg9[%c0_81, %c0_82], %334 {strides = array<i32>} : memref<8x128xf32, #tpu.memory_space<vmem>>, vector<8x128xf32>,
    return
  }
}

</mosaic_0001>

<bundles_post_ra>
// kernel: tpu_custom_call.1
= control target key start
LH: loop header
LB: loop body
LE: loop exit
PB: predicated region body
PF: predicated region fallthrough
CT: control target
= control target key end

     0   :  { %14 = vsyncpa [#allocation4], 0  ;;  %s3187_s0 = inlined_call_operand.vmem [shape: f32[64,16], index: 0, kind: input, shape index: {}]   ;;  %s3188_s1 = inlined_call_operand.hbm [shape: f32[16,128], index: 1, kind: input, shape index: {}]   ;;  %s3189_s2 = inlined_call_operand.vmem [shape: f32[32,128], index: 2, kind: input, shape index: {}]   ;;  %s3190_s3 = inlined_call_operand.vmem [shape: f32[1,128], index: 3, kind: input, shape index: {}]   ;;  %s3191_s4 = inlined_call_operand.vmem [shape: f32[32,128], index: 4, kind: input, shape index: {}]   ;;  %s3192_s5 = inlined_call_operand.vmem [shape: f32[32,128], index: 5, kind: input, shape index: {}]   ;;  %s3193_s6 = inlined_call_operand.vmem [shape: f32[1,128], index: 6, kind: input, shape index: {}]   ;;  %s3194_s7 = inlined_call_operand.hbm [shape: f32[32,128], index: 7, kind: input, shape index: {}]   ;;  %s3195_s8 = inlined_call_operand.vmem [shape: f32[1,128], index: 8, kind: input, shape index: {}]   ;;  %s3196_s9 = inlined_call_operand.hbm [shape: f32[8,128], index: 9, kind: output, shape index: {}]  }
   0x1   :  { %15 = vsyncpa [#allocation7], 0 }
   0x2   :  { %16 = vsyncpa [#allocation5], 0  ;;  %s2752_s30 = smov [#allocation3]   ;;  %s2680_s13 = scalar_lea.hbm %s3188_s1, 256 }
   0x3   :  { %s24_s10 = sshll.u32 %s2752_s30, 4  ;;  %p2681_p0 = scmp.ne.s32.totalorder %s3188_s1, %s2680_s13  ;;  %s25_s10 = int_to_ptr.vmem [resolvable:$true] %s24_s10 }
   0x4   :  { %p2684_p1 = scmp.lt.u32.totalorder %s2680_s13, %s3188_s1 }
   0x6   :  { %p2686_p2 = pnand %p2684_p1, %p2681_p0 }
   0x8   :  { %2689 = shalt.err (!%p2686_p2)
}
   0x9   :  { %s2690_s18 = scalar_lea.vmem %s25_s10, 256  ;;  %p2695_p4 = scmp.lt.s32.totalorder %s25_s10, %s25_s10 }
   0xa   :  { %p2691_p3 = scmp.ne.s32.totalorder %s25_s10, %s2690_s18  ;;  %p2696_p5 = scmp.lt.s32.totalorder %s2690_s18, %s2690_s18 }
   0xc   :  { %p2697_p6 = por %p2696_p5, %p2695_p4 }
   0xe   :  { %p2698_p7 = pnand %p2697_p6, %p2691_p3 }
  0x10   :  { %2701 = shalt.err (!%p2698_p7)
}
  0x11   :  { %s2753_s19 = smov 128   ;;  %s2754_s20 = smov 8  }
  0x12   :  { %30 = dma.hbm_to_vmem [thread:$0]  %s3188_s1, 256, %s25_s10, [#allocation4], %s2753_s19, %s2753_s19, %s2754_s20  }
  0x13   :  { %s2755_s23 = smov [#allocation6]   ;;  %s2702_s27 = scalar_lea.hbm %s3194_s7, 512 }
  0x14   :  { %s46_s24 = sshll.u32 %s2755_s23, 4  ;;  %p2703_p8 = scmp.ne.s32.totalorder %s3194_s7, %s2702_s27  ;;  %s47_s24 = int_to_ptr.vmem [resolvable:$true] %s46_s24 }
  0x15   :  { %p2706_p9 = scmp.lt.u32.totalorder %s2702_s27, %s3194_s7 }
  0x17   :  { %p2708_p10 = pnand %p2706_p9, %p2703_p8 }
  0x19   :  { %2711 = shalt.err (!%p2708_p10)
}
  0x1a   :  { %s2712_s12 = scalar_lea.vmem %s47_s24, 512  ;;  %p2717_p12 = scmp.lt.s32.totalorder %s47_s24, %s47_s24 }
  0x1b   :  { %p2713_p11 = scmp.ne.s32.totalorder %s47_s24, %s2712_s12  ;;  %p2718_p13 = scmp.lt.s32.totalorder %s2712_s12, %s2712_s12 }
  0x1d   :  { %p2719_p0 = por %p2718_p13, %p2717_p12 }
  0x1f   :  { %p2720_p1 = pnand %p2719_p0, %p2713_p11 }
  0x21   :  { %2723 = shalt.err (!%p2720_p1)
}
  0x22   :  { %52 = dma.hbm_to_vmem [thread:$0]  %s3194_s7, 512, %s47_s24, [#allocation7], %s2753_s19, %s2753_s19, %s2754_s20  }
  0x23   :  { %2746 = dma.done.wait [#allocation4], 256  }
  0x24   :  { %2747 = vsyncadd [#allocation4], 4294967040 }
  0x25   :  { %2748 = dma.done.wait [#allocation7], 512  }
  0x26   :  { %2749 = vsyncadd [#allocation7], 4294966784  ;;  %v2756_v0 = vmov 0.0|0.0   ;;  %vm2757_vm0 = vmmov 0   ;;  %v2758_v1 = vmov 0.0   ;;  %vm82_vm1 = vcmask 130048  }
  0x27   :  { %2432 = vmatprep.subr.bf16.mxu1 %v2756_v0  ;;  %2229 = vmatprep.mubr.msk.f32.mxu1 %vm2757_vm0, %v2758_v1  ;;  %v61_v2 = vld [vmem:[#allocation3] sm:$0xff]  ;;  %v62_v3 = vld [vmem:[#allocation3 + $0x8] sm:$0xff]  ;;  %v65_v9 = vld [vmem:[%s3189_s2 + $0x10] sm:$0xff]  ;;  %s2759_s25 = smov 64   ;;  %vm212_vm2 = vcmask 261120   ;;  %s2761_s11 = smov [#allocation8]  }
  0x28   :  { %v63_v4 = vld [vmem:[%s3189_s2] sm:$0xff]  ;;  %v2428_v5 = vpack.c.bf16 %v62_v3, %v61_v2  ;;  %v64_v6 = vld [vmem:[%s3189_s2 + $0x8] sm:$0xff]  ;;  %v66_v10 = vld [vmem:[%s3189_s2 + $0x18] sm:$0xff]  ;;  %s2038_s12 = sshll.u32 %s2761_s11, 4  ;;  %s2039_s12 = int_to_ptr.vmem [resolvable:$true] %s2038_s12 }
  0x29   :  { %v68_v7 = vld [vmem:[%s3187_s0] sm:$0xff]  ;;  %v2848_v8 = vpack.c.bf16 %v64_v6, %v63_v4  ;;  %v69_v11 = vld [vmem:[%s3187_s0 + $0x8] sm:$0xff]  ;;  %v2861_v12 = vpack.c.bf16 %v66_v10, %v65_v9  ;;  %v70_v48 = vld [vmem:[%s3187_s0 + $0x10] sm:$0xff]  ;;  %s2724_s1 = scalar_lea.vmem %s2039_s12, 128  ;;  %p2729_p3 = scmp.lt.s32.totalorder %s2039_s12, %s2039_s12 }
  0x2a   :  { %2209 = vmatprep.mubr.msk.f32.mxu0 %vm82_vm1, %v68_v7  ;;  %2429 = vmatprep.subr.bf16.mxu0 %v2428_v5  ;;  %v2882_v13 = vld [vmem:[%s3190_s3] ss:$0 sm:$0xff]  ;;  %s2760_s3 = smov 32   ;;  %v71_v49 = vld [vmem:[%s3187_s0 + $0x18] sm:$0xff]  ;;  %v73_v51 = vld [vmem:[%s3187_s0 + $0x28] sm:$0xff]  ;;  %p2725_p2 = scmp.ne.s32.totalorder %s2039_s12, %s2724_s1 }
  0x2b   :  { %2434 = vmatpush3.bf16.msra.mxu1 %v2848_v8  ;;  %2431 = vmatpush3.bf16.msra.mxu0 %v2428_v5  ;;  %v72_v50 = vld [vmem:[%s3187_s0 + $0x20] sm:$0xff]  ;;  %v74_v52 = vld [vmem:[%s3187_s0 + $0x30] sm:$0xff]  ;;  %v75_v53 = vld [vmem:[%s3187_s0 + $0x38] sm:$0xff]  ;;  %p2730_p4 = scmp.lt.s32.totalorder %s2724_s1, %s2724_s1 }
  0x2c   :  { %2435 = vmatprep.subr.bf16.mxu1 %v2756_v0  ;;  %2444 = vmatprep.subr.bf16.mxu0 %v2756_v0 }
  0x2d   :  { %p2731_p5 = por %p2730_p4, %p2729_p3 }
  0x2e   :  { %2210 = vmatmul.mubr.msk.f32.vlgmr.msra.gmra.mrb[0].mxu0 %vm82_vm1, %v69_v11 }
  0x2f   :  { %2437 = vmatpush3.bf16.msra.mxu1 %v2861_v12  ;;  %2446 = vmatpush3.bf16.msra.mxu0 %v2848_v8  ;;  %p2732_p6 = pnand %p2731_p5, %p2725_p2 }
  0x30   :  { %2438 = vmatprep.subr.bf16.mxu1 %v2756_v0  ;;  %2447 = vmatprep.subr.bf16.mxu0 %v2756_v0 }
  0x31   :  { %2212 = vmatprep.mubr.msk.f32.mxu0 %vm82_vm1, %v70_v48 }
  0x32   :  { %2230 = vmatmul.mubr.f32.vlgmr.msra.gmra.mrb[0].mxu1 %v2758_v1  ;;  %2213 = vmatmul.mubr.msk.f32.gmra.mrb[2].mxu0 %vm82_vm1, %v71_v49 }
  0x33   :  { %2440 = vmatpush3.bf16.msra.mxu1 %v2848_v8  ;;  %2240 = vmatprep.mubr.msk.f32.mxu1 %vm2757_vm0, %v2758_v1 }
  0x34   :  { %2441 = vmatprep.subr.bf16.mxu1 %v2756_v0  ;;  %2449 = vmatpush3.bf16.msra.mxu0 %v2861_v12 }
  0x35   :  { %2456 = vmatprep.subr.bf16.mxu0 %v2756_v0  ;;  %2215 = vmatprep.mubr.msk.f32.mxu0 %vm82_vm1, %v72_v50 }
  0x36   :  { %2216 = vmatmul.mubr.msk.f32.gmra.mrb[4].mxu0 %vm82_vm1, %v73_v51 }
  0x37   :  { %2443 = vmatpush3.bf16.msra.mxu1 %v2861_v12  ;;  %2218 = vmatprep.mubr.msk.f32.mxu0 %vm82_vm1, %v74_v52 }
  0x38   :  { %2450 = vmatprep.subr.bf16.mxu1 %v2756_v0 }
  0x3a   :  { %2219 = vmatmul.mubr.msk.f32.gmra.mrb[6].mxu0 %vm82_vm1, %v75_v53 }
  0x3b   :  { %2251 = vmatprep.mubr.msk.f32.mxu0 %vm2757_vm0, %v2758_v1 }
 0x101   :  { %v2211_v14 = vpop.f32.mrb[0].mxu0 }
 0x102   :  { %v173_v15 = vpop.f32.mrb[1].mxu0  ;;  %v179_v34 = vadd.f32 %v2211_v14, %v2882_v13 }
 0x103   :  { %v174_v16 = vadd.f32 %v2882_v13, %v173_v15 }
 0x105   :  { %v282_v17 = vpop.f32.mrb[0].mxu1  ;;  %v2214_v57 = vpop.f32.mrb[2].mxu0 }
 0x106   :  { %v286_v18 = vadd.f32 %v282_v17, %v174_v16  ;;  %v2231_v19 = vpop.f32.mrb[1].mxu1  ;;  %v183_v58 = vpop.f32.mrb[3].mxu0 }
 0x107   :  { %v184_v2 = vadd.f32 %v2882_v13, %v183_v58 }
 0x108   :  { %2552 = vtanh.f32 %v286_v18  ;;  %v2057_v21 = vmul.f32 -1.442695, %v286_v18 }
 0x109   :  { %v2928_v59 = vpop.f32.mrb[4].mxu0 }
 0x10a   :  { %2554 = vpow2.f32 %v2057_v21  ;;  %v2930_v60 = vpop.f32.mrb[5].mxu0 }
 0x10d   :  { %v2932_v61 = vpop.f32.mrb[6].mxu0 }
 0x10e   :  { %v2934_v62 = vpop.f32.mrb[7].mxu0 }
 0x112   :  { %v2553_v20 = vpop.eup %2552 }
 0x113   :  { %294 = vrot.lane.b32.xlu0 %v2553_v20, %s2759_s25 }
 0x114   :  { %v2555_v22 = vpop.eup %2554 }
 0x115   :  { %v290_v23 = vadd.f32 1.0, %v2555_v22 }
 0x117   :  { %2556 = vrcp.f32 %v290_v23  ;;  %v189_v23 = vadd.f32 %v2214_v57, %v2882_v13 }
 0x121   :  { %v2557_v24 = vpop.eup %2556 }
 0x122   :  { %v296_v27 = vmul.f32 0.0, %v2557_v24 }
 0x185   :  { %v295_v25 = vpop.permute.xlu0 %294 }
 0x186   :  { %v297_v26 = vmul.f32 %v2557_v24, %v295_v25 }
 0x188   :  { %299 = vrot.lane.b32.xlu0 %v297_v26, %s2760_s3 }
 0x1fa   :  { %v300_v28 = vpop.permute.xlu0 %299 }
 0x1fb   :  { %v302_v29 = vadd.f32 %v300_v28, %v296_v27 }
 0x1fd   :  { %2558 = vtanh.f32 %v302_v29 }
 0x207   :  { %v2559_v30 = vpop.eup %2558 }
 0x208   :  { %305 = vrot.lane.b32.xlu1 %v2559_v30, %s2759_s25 }
 0x27a   :  { %v306_v31 = vpop.permute.xlu1 %305 }
 0x27b   :  { %v308_v32 = vmul.f32 %v2557_v24, %v306_v31 }
 0x27d   :  { %310 = vrot.lane.b32.xlu1 %v308_v32, %s2760_s3 }
 0x2ef   :  { %v311_v33 = vpop.permute.xlu1 %310 }
 0x2f0   :  { %313 = vst.msk [vmem:[#allocation2] sm:$0xff] %vm212_vm2, %v311_v33  ;;  %2241 = vmatmul.mubr.msk.f32.vlgmr.msra.gmra.mrb[2].mxu1 %vm212_vm2, %v311_v33 }
 0x2f1   :  { %2452 = vmatpush3.bf16.msra.mxu1 %v2848_v8  ;;  %2262 = vmatprep.mubr.msk.f32.mxu1 %vm2757_vm0, %v2758_v1 }
 0x2f2   :  { %2453 = vmatprep.subr.bf16.mxu1 %v2756_v0 }
 0x2f5   :  { %2455 = vmatpush3.bf16.msra.mxu1 %v2861_v12 }
 0x2f6   :  { %2462 = vmatprep.subr.bf16.mxu1 %v2756_v0 }
 0x3c3   :  { %v382_v35 = vpop.f32.mrb[2].mxu1 }
 0x3c4   :  { %v386_v36 = vadd.f32 %v382_v35, %v179_v34  ;;  %v2242_v37 = vpop.f32.mrb[3].mxu1 }
 0x3c6   :  { %2560 = vtanh.f32 %v386_v36  ;;  %v2059_v39 = vmul.f32 -1.442695, %v386_v36 }
 0x3c8   :  { %2562 = vpow2.f32 %v2059_v39 }
 0x3d0   :  { %v2561_v38 = vpop.eup %2560 }
 0x3d1   :  { %394 = vrot.lane.b32.xlu0 %v2561_v38, %s2759_s25 }
 0x3d2   :  { %v2563_v40 = vpop.eup %2562 }
 0x3d3   :  { %v390_v41 = vadd.f32 1.0, %v2563_v40 }
 0x3d5   :  { %2564 = vrcp.f32 %v390_v41  ;;  %v194_v41 = vadd.f32 %v2882_v13, %v2930_v60  ;;  %v199_v60 = vadd.f32 %v2928_v59, %v2882_v13 }
 0x3df   :  { %v2565_v42 = vpop.eup %2564 }
 0x3e0   :  { %v396_v45 = vmul.f32 %v2565_v42, %v302_v29 }
 0x443   :  { %v395_v43 = vpop.permute.xlu0 %394 }
 0x444   :  { %v397_v44 = vmul.f32 %v2565_v42, %v395_v43 }
 0x446   :  { %399 = vrot.lane.b32.xlu1 %v397_v44, %s2760_s3 }
 0x4b8   :  { %v400_v46 = vpop.permute.xlu1 %399 }
 0x4b9   :  { %v402_v47 = vadd.f32 %v400_v46, %v396_v45 }
 0x4bb   :  { %2566 = vtanh.f32 %v402_v47 }
 0x4c5   :  { %v2567_v54 = vpop.eup %2566 }
 0x4c6   :  { %405 = vrot.lane.b32.xlu0 %v2567_v54, %s2759_s25 }
 0x538   :  { %v406_v55 = vpop.permute.xlu0 %405 }
 0x539   :  { %v408_v56 = vmul.f32 %v2565_v42, %v406_v55 }
 0x53b   :  { %410 = vrot.lane.b32.xlu1 %v408_v56, %s2760_s3 }
 0x5ad   :  { %v411_v63 = vpop.permute.xlu1 %410 }
 0x5ae   :  { %413 = vst.msk [vmem:[#allocation2 + $0x8] sm:$0xff] %vm212_vm2, %v411_v63  ;;  %2252 = vmatmul.mubr.msk.f32.vlgmr.msra.gmra.mrb[8].mxu0 %vm212_vm2, %v411_v63 }
 0x5af   :  { %2458 = vmatpush3.bf16.msra.mxu0 %v2848_v8  ;;  %2273 = vmatprep.mubr.msk.f32.mxu0 %vm2757_vm0, %v2758_v1 }
 0x5b0   :  { %2459 = vmatprep.subr.bf16.mxu0 %v2756_v0 }
 0x5b3   :  { %2461 = vmatpush3.bf16.msra.mxu0 %v2861_v12 }
 0x5b4   :  { %2468 = vmatprep.subr.bf16.mxu0 %v2756_v0 }
 0x681   :  { %v482_v3 = vpop.f32.mrb[8].mxu0 }
 0x682   :  { %v486_v4 = vadd.f32 %v482_v3, %v184_v2  ;;  %v2253_v5 = vpop.f32.mrb[9].mxu0 }
 0x684   :  { %2568 = vtanh.f32 %v486_v4  ;;  %v2061_v7 = vmul.f32 -1.442695, %v486_v4 }
 0x686   :  { %2570 = vpow2.f32 %v2061_v7 }
 0x68e   :  { %v2569_v6 = vpop.eup %2568 }
 0x68f   :  { %494 = vrot.lane.b32.xlu0 %v2569_v6, %s2759_s25 }
 0x690   :  { %v2571_v9 = vpop.eup %2570 }
 0x691   :  { %v490_v10 = vadd.f32 1.0, %v2571_v9 }
 0x693   :  { %2572 = vrcp.f32 %v490_v10 }
 0x69d   :  { %v2573_v11 = vpop.eup %2572 }
 0x69e   :  { %v496_v16 = vmul.f32 %v2573_v11, %v402_v47 }
 0x701   :  { %v495_v14 = vpop.permute.xlu0 %494 }
 0x702   :  { %v497_v15 = vmul.f32 %v2573_v11, %v495_v14  ;;  %v1014_v14 = vld [vmem:[%s3191_s4] sm:$0xff] }
 0x704   :  { %499 = vrot.lane.b32.xlu1 %v497_v15, %s2760_s3  ;;  %v1015_v15 = vld [vmem:[%s3191_s4 + $0x8] sm:$0xff] }
 0x776   :  { %v500_v17 = vpop.permute.xlu1 %499 }
 0x777   :  { %v502_v18 = vadd.f32 %v500_v17, %v496_v16  ;;  %v2480_v16 = vpack.c.bf16 %v1015_v15, %v1014_v14 }
 0x779   :  { %2574 = vtanh.f32 %v502_v18 }
 0x783   :  { %v2575_v19 = vpop.eup %2574 }
 0x784   :  { %505 = vrot.lane.b32.xlu0 %v2575_v19, %s2759_s25 }
 0x7f6   :  { %v506_v20 = vpop.permute.xlu0 %505 }
 0x7f7   :  { %v508_v21 = vmul.f32 %v2573_v11, %v506_v20  ;;  %v1016_v20 = vld [vmem:[%s3191_s4 + $0x10] sm:$0xff] }
 0x7f9   :  { %510 = vrot.lane.b32.xlu1 %v508_v21, %s2760_s3  ;;  %v1017_v21 = vld [vmem:[%s3191_s4 + $0x18] sm:$0xff] }
 0x86b   :  { %v511_v22 = vpop.permute.xlu1 %510 }
 0x86c   :  { %513 = vst.msk [vmem:[#allocation2 + $0x10] sm:$0xff] %vm212_vm2, %v511_v22  ;;  %2263 = vmatmul.mubr.msk.f32.vlgmr.msra.gmra.mrb[4].mxu1 %vm212_vm2, %v511_v22  ;;  %v2484_v22 = vpack.c.bf16 %v1017_v21, %v1016_v20 }
 0x86d   :  { %2464 = vmatpush3.bf16.msra.mxu1 %v2848_v8  ;;  %2284 = vmatprep.mubr.msk.f32.mxu1 %vm2757_vm0, %v2758_v1 }
 0x86e   :  { %2465 = vmatprep.subr.bf16.mxu1 %v2756_v0 }
 0x871   :  { %2467 = vmatpush3.bf16.msra.mxu1 %v2861_v12 }
 0x872   :  { %2474 = vmatprep.subr.bf16.mxu1 %v2756_v0 }
 0x93f   :  { %v582_v24 = vpop.f32.mrb[4].mxu1 }
 0x940   :  { %v586_v25 = vadd.f32 %v582_v24, %v189_v23  ;;  %v2264_v26 = vpop.f32.mrb[5].mxu1  ;;  %v1023_v24 = vld [vmem:[#allocation2] sm:$0xff] }
 0x941   :  { %v1025_v26 = vld [vmem:[#allocation2 + $0x10] sm:$0xff] }
 0x942   :  { %2576 = vtanh.f32 %v586_v25  ;;  %v2063_v28 = vmul.f32 -1.442695, %v586_v25  ;;  %v1024_v25 = vld [vmem:[#allocation2 + $0x8] sm:$0xff] }
 0x944   :  { %2578 = vpow2.f32 %v2063_v28 }
 0x94c   :  { %v2577_v27 = vpop.eup %2576 }
 0x94d   :  { %594 = vrot.lane.b32.xlu0 %v2577_v27, %s2759_s25 }
 0x94e   :  { %v2579_v29 = vpop.eup %2578 }
 0x94f   :  { %v590_v30 = vadd.f32 1.0, %v2579_v29 }
 0x951   :  { %2580 = vrcp.f32 %v590_v30  ;;  %v204_v30 = vadd.f32 %v2882_v13, %v2934_v62 }
 0x95b   :  { %v2581_v31 = vpop.eup %2580 }
 0x95c   :  { %v596_v34 = vmul.f32 %v2581_v31, %v502_v18 }
 0x9bf   :  { %v595_v32 = vpop.permute.xlu0 %594 }
 0x9c0   :  { %v597_v33 = vmul.f32 %v2581_v31, %v595_v32 }
 0x9c2   :  { %599 = vrot.lane.b32.xlu1 %v597_v33, %s2760_s3 }
 0xa34   :  { %v600_v35 = vpop.permute.xlu1 %599 }
 0xa35   :  { %v602_v36 = vadd.f32 %v600_v35, %v596_v34 }
 0xa37   :  { %2582 = vtanh.f32 %v602_v36 }
 0xa41   :  { %v2583_v37 = vpop.eup %2582 }
 0xa42   :  { %605 = vrot.lane.b32.xlu0 %v2583_v37, %s2759_s25 }
 0xab4   :  { %v606_v38 = vpop.permute.xlu0 %605 }
 0xab5   :  { %v608_v39 = vmul.f32 %v2581_v31, %v606_v38 }
 0xab7   :  { %610 = vrot.lane.b32.xlu1 %v608_v39, %s2760_s3 }
 0xb29   :  { %v611_v40 = vpop.permute.xlu1 %610 }
 0xb2a   :  { %613 = vst.msk [vmem:[#allocation2 + $0x18] sm:$0xff] %vm212_vm2, %v611_v40  ;;  %2274 = vmatmul.mubr.msk.f32.vlgmr.msra.gmra.mrb[10].mxu0 %vm212_vm2, %v611_v40 }
 0xb2b   :  { %2470 = vmatpush3.bf16.msra.mxu0 %v2848_v8  ;;  %2295 = vmatprep.mubr.msk.f32.mxu0 %vm2757_vm0, %v2758_v1 }
 0xb2c   :  { %2471 = vmatprep.subr.bf16.mxu0 %v2756_v0 }
 0xb2f   :  { %2473 = vmatpush3.bf16.msra.mxu0 %v2861_v12 }
 0xb30   :  { %2481 = vmatprep.subr.bf16.mxu0 %v2480_v16 }
 0xb31   :  { %v1026_v27 = vld [vmem:[#allocation2 + $0x18] sm:$0xff] }
 0xbfd   :  { %v682_v42 = vpop.f32.mrb[10].mxu0 }
 0xbfe   :  { %v686_v43 = vadd.f32 %v682_v42, %v194_v41  ;;  %v2275_v44 = vpop.f32.mrb[11].mxu0 }
 0xc00   :  { %2584 = vtanh.f32 %v686_v43  ;;  %v2065_v46 = vmul.f32 -1.442695, %v686_v43 }
 0xc02   :  { %2586 = vpow2.f32 %v2065_v46 }
 0xc0a   :  { %v2585_v45 = vpop.eup %2584 }
 0xc0b   :  { %694 = vrot.lane.b32.xlu0 %v2585_v45, %s2759_s25 }
 0xc0c   :  { %v2587_v47 = vpop.eup %2586 }
 0xc0d   :  { %v690_v48 = vadd.f32 1.0, %v2587_v47 }
 0xc0f   :  { %2588 = vrcp.f32 %v690_v48 }
 0xc19   :  { %v2589_v49 = vpop.eup %2588 }
 0xc1a   :  { %v696_v52 = vmul.f32 %v2589_v49, %v602_v36 }
 0xc7d   :  { %v695_v50 = vpop.permute.xlu0 %694 }
 0xc7e   :  { %v697_v51 = vmul.f32 %v2589_v49, %v695_v50  ;;  %v1018_v50 = vld [vmem:[%s3192_s5] sm:$0xff] }
 0xc80   :  { %699 = vrot.lane.b32.xlu1 %v697_v51, %s2760_s3  ;;  %v1019_v51 = vld [vmem:[%s3192_s5 + $0x8] sm:$0xff] }
 0xcf2   :  { %v700_v53 = vpop.permute.xlu1 %699 }
 0xcf3   :  { %v702_v54 = vadd.f32 %v700_v53, %v696_v52  ;;  %v3034_v52 = vpack.c.bf16 %v1019_v51, %v1018_v50  ;;  %v1020_v53 = vld [vmem:[%s3192_s5 + $0x10] sm:$0xff] }
 0xcf5   :  { %2590 = vtanh.f32 %v702_v54 }
 0xcff   :  { %v2591_v55 = vpop.eup %2590 }
 0xd00   :  { %705 = vrot.lane.b32.xlu0 %v2591_v55, %s2759_s25 }
 0xd72   :  { %v706_v56 = vpop.permute.xlu0 %705 }
 0xd73   :  { %v708_v57 = vmul.f32 %v2589_v49, %v706_v56 }
 0xd75   :  { %710 = vrot.lane.b32.xlu1 %v708_v57, %s2760_s3 }
 0xde7   :  { %v711_v58 = vpop.permute.xlu1 %710 }
 0xde8   :  { %713 = vst.msk [vmem:[#allocation2 + $0x20] sm:$0xff] %vm212_vm2, %v711_v58  ;;  %2285 = vmatmul.mubr.msk.f32.vlgmr.msra.gmra.mrb[6].mxu1 %vm212_vm2, %v711_v58 }
 0xde9   :  { %2476 = vmatpush3.bf16.msra.mxu1 %v2848_v8  ;;  %2306 = vmatprep.mubr.msk.f32.mxu1 %vm2757_vm0, %v2758_v1 }
 0xdea   :  { %2477 = vmatprep.subr.bf16.mxu1 %v2756_v0 }
 0xded   :  { %2479 = vmatpush3.bf16.msra.mxu1 %v2861_v12 }
 0xdee   :  { %2488 = vmatprep.subr.bf16.mxu1 %v2756_v0 }
 0xdef   :  { %v1027_v28 = vld [vmem:[#allocation2 + $0x20] sm:$0xff] }
 0xebb   :  { %v782_v63 = vpop.f32.mrb[6].mxu1 }
 0xebc   :  { %v786_v2 = vadd.f32 %v782_v63, %v199_v60  ;;  %v2286_v3 = vpop.f32.mrb[7].mxu1  ;;  %v209_v63 = vadd.f32 %v2932_v61, %v2882_v13 }
 0xebe   :  { %2592 = vtanh.f32 %v786_v2  ;;  %v2067_v8 = vmul.f32 -1.442695, %v786_v2 }
 0xec0   :  { %2594 = vpow2.f32 %v2067_v8  ;;  %v3070_v8 = vld [vmem:[%s3193_s6] ss:$0 sm:$0xff] }
 0xec8   :  { %v2593_v4 = vpop.eup %2592 }
 0xec9   :  { %794 = vrot.lane.b32.xlu0 %v2593_v4, %s2759_s25 }
 0xeca   :  { %v2595_v5 = vpop.eup %2594 }
 0xecb   :  { %v790_v6 = vadd.f32 1.0, %v2595_v5 }
 0xecd   :  { %2596 = vrcp.f32 %v790_v6 }
 0xed7   :  { %v2597_v7 = vpop.eup %2596 }
 0xed8   :  { %v796_v10 = vmul.f32 %v2597_v7, %v702_v54  ;;  %v1021_v54 = vld [vmem:[%s3192_s5 + $0x18] sm:$0xff] }
 0xed9   :  { %v3044_v55 = vpack.c.bf16 %v1021_v54, %v1020_v53 }
 0xf3b   :  { %v795_v9 = vpop.permute.xlu0 %794 }
 0xf3c   :  { %v797_v12 = vmul.f32 %v2597_v7, %v795_v9 }
 0xf3e   :  { %799 = vrot.lane.b32.xlu1 %v797_v12, %s2760_s3 }
 0xfb0   :  { %v800_v11 = vpop.permute.xlu1 %799 }
 0xfb1   :  { %v802_v59 = vadd.f32 %v800_v11, %v796_v10 }
 0xfb3   :  { %2598 = vtanh.f32 %v802_v59 }
 0xfbd   :  { %v2599_v17 = vpop.eup %2598 }
 0xfbe   :  { %805 = vrot.lane.b32.xlu0 %v2599_v17, %s2759_s25 }
0x1030   :  { %v806_v18 = vpop.permute.xlu0 %805 }
0x1031   :  { %v808_v19 = vmul.f32 %v2597_v7, %v806_v18 }
0x1033   :  { %810 = vrot.lane.b32.xlu1 %v808_v19, %s2760_s3 }
0x10a5   :  { %v811_v23 = vpop.permute.xlu1 %810 }
0x10a6   :  { %813 = vst.msk [vmem:[#allocation2 + $0x28] sm:$0xff] %vm212_vm2, %v811_v23  ;;  %2296 = vmatmul.mubr.msk.f32.vlgmr.msra.gmra.mrb[12].mxu0 %vm212_vm2, %v811_v23 }
0x10a7   :  { %2483 = vmatpush3.bf16.msra.mxu0 %v2480_v16  ;;  %2317 = vmatprep.mubr.msk.f32.mxu0 %vm212_vm2, %v1023_v24 }
0x10a8   :  { %2485 = vmatprep.subr.bf16.mxu0 %v2484_v22 }
0x10ab   :  { %2487 = vmatpush3.bf16.msra.mxu0 %v2484_v22 }
0x10ac   :  { %2500 = vmatprep.subr.bf16.mxu0 %v2756_v0 }
0x10ad   :  { %v1028_v29 = vld [vmem:[#allocation2 + $0x28] sm:$0xff] }
0x10ae   :  { %2318 = vmatmul.mubr.msk.f32.vlgmr.msra.gmra.mrb[14].mxu0 %vm212_vm2, %v1024_v25 }
0x10af   :  { %2320 = vmatprep.mubr.msk.f32.mxu0 %vm212_vm2, %v1025_v26  ;;  %2502 = vmatpush3.bf16.msra.mxu0 %v3034_v52 }
0x10b0   :  { %2503 = vmatprep.subr.bf16.mxu0 %v2756_v0 }
0x10b2   :  { %2321 = vmatmul.mubr.msk.f32.gmra.mrb[16].mxu0 %vm212_vm2, %v1026_v27 }
0x10b3   :  { %2323 = vmatprep.mubr.msk.f32.mxu0 %vm212_vm2, %v1027_v28  ;;  %2505 = vmatpush3.bf16.msra.mxu0 %v3044_v55 }
0x10b4   :  { %2512 = vmatprep.subr.bf16.mxu0 %v2756_v0 }
0x10b6   :  { %2324 = vmatmul.mubr.msk.f32.gmra.mrb[18].mxu0 %vm212_vm2, %v1028_v29 }
0x1179   :  { %v882_v31 = vpop.f32.mrb[12].mxu0 }
0x117a   :  { %v886_v32 = vadd.f32 %v882_v31, %v204_v30  ;;  %v2297_v33 = vpop.f32.mrb[13].mxu0 }
0x117c   :  { %2600 = vtanh.f32 %v886_v32  ;;  %v2069_v41 = vmul.f32 -1.442695, %v886_v32 }
0x117e   :  { %2602 = vpow2.f32 %v2069_v41 }
0x1181   :  { %v3012_v34 = vpop.f32.mrb[14].mxu0 }
0x1182   :  { %v1127_v35 = vpop.f32.mrb[15].mxu0 }
0x1183   :  { %v1128_v5 = vadd.f32 %v3070_v8, %v1127_v35 }
0x1185   :  { %v3014_v36 = vpop.f32.mrb[16].mxu0 }
0x1186   :  { %v2601_v37 = vpop.eup %2600  ;;  %v3016_v38 = vpop.f32.mrb[17].mxu0 }
0x1187   :  { %894 = vrot.lane.b32.xlu0 %v2601_v37, %s2759_s25  ;;  %v1133_v37 = vadd.f32 %v3012_v34, %v3070_v8 }
0x1188   :  { %v2603_v62 = vpop.eup %2602 }
0x1189   :  { %v3019_v39 = vpop.f32.mrb[18].mxu0  ;;  %v890_v42 = vadd.f32 1.0, %v2603_v62 }
0x118a   :  { %v3021_v40 = vpop.f32.mrb[19].mxu0 }
0x118b   :  { %2604 = vrcp.f32 %v890_v42 }
0x1195   :  { %v2605_v43 = vpop.eup %2604 }
0x1196   :  { %v896_v46 = vmul.f32 %v2605_v43, %v802_v59 }
0x11f9   :  { %v895_v44 = vpop.permute.xlu0 %894 }
0x11fa   :  { %v897_v45 = vmul.f32 %v2605_v43, %v895_v44 }
0x11fc   :  { %899 = vrot.lane.b32.xlu1 %v897_v45, %s2760_s3 }
0x126e   :  { %v900_v47 = vpop.permute.xlu1 %899 }
0x126f   :  { %v3024_v48 = vadd.f32 %v900_v47, %v896_v46 }
0x1271   :  { %2606 = vtanh.f32 %v3024_v48 }
0x127b   :  { %v2607_v49 = vpop.eup %2606 }
0x127c   :  { %905 = vrot.lane.b32.xlu0 %v2607_v49, %s2759_s25 }
0x12ee   :  { %v906_v56 = vpop.permute.xlu0 %905 }
0x12ef   :  { %v908_v57 = vmul.f32 %v2605_v43, %v906_v56 }
0x12f1   :  { %910 = vrot.lane.b32.xlu1 %v908_v57, %s2760_s3 }
0x1363   :  { %v911_v58 = vpop.permute.xlu1 %910 }
0x1364   :  { %913 = vst.msk [vmem:[#allocation2 + $0x30] sm:$0xff] %vm212_vm2, %v911_v58  ;;  %2307 = vmatmul.mubr.msk.f32.vlgmr.msra.gmra.mrb[8].mxu1 %vm212_vm2, %v911_v58 }
0x1365   :  { %2490 = vmatpush3.bf16.msra.mxu1 %v3034_v52  ;;  %2337 = vmatprep.mubr.msk.f32.mxu1 %vm2757_vm0, %v2758_v1 }
0x1366   :  { %2491 = vmatprep.subr.bf16.mxu1 %v2756_v0 }
0x1369   :  { %2493 = vmatpush3.bf16.msra.mxu1 %v3044_v55 }
0x136a   :  { %2494 = vmatprep.subr.bf16.mxu1 %v2756_v0 }
0x136b   :  { %v1029_v60 = vld [vmem:[#allocation2 + $0x30] sm:$0xff] }
0x136c   :  { %2338 = vmatmul.mubr.f32.vlgmr.msra.gmra.mrb[10].mxu1 %v2758_v1  ;;  %2326 = vmatprep.mubr.msk.f32.mxu0 %vm212_vm2, %v1029_v60 }
0x136d   :  { %2496 = vmatpush3.bf16.msra.mxu1 %v3034_v52  ;;  %2348 = vmatprep.mubr.msk.f32.mxu1 %vm2757_vm0, %v2758_v1 }
0x136e   :  { %2497 = vmatprep.subr.bf16.mxu1 %v2756_v0 }
0x1371   :  { %2499 = vmatpush3.bf16.msra.mxu1 %v3044_v55 }
0x1372   :  { %2506 = vmatprep.subr.bf16.mxu1 %v2756_v0 }
0x1437   :  { %v982_v2 = vpop.f32.mrb[8].mxu1 }
0x1438   :  { %v986_v3 = vadd.f32 %v982_v2, %v209_v63  ;;  %v2308_v4 = vpop.f32.mrb[9].mxu1 }
0x143a   :  { %v2071_v20 = vmul.f32 -1.442695, %v986_v3 }
0x143f   :  { %v1232_v6 = vpop.f32.mrb[10].mxu1 }
0x1440   :  { %v1236_v7 = vadd.f32 %v1232_v6, %v1128_v5  ;;  %v2339_v9 = vpop.f32.mrb[11].mxu1 }
0x1442   :  { %2608 = vtanh.f32 %v1236_v7  ;;  %v2081_v10 = vmul.f32 -1.442695, %v1236_v7 }
0x1444   :  { %2610 = vpow2.f32 %v2081_v10 }
0x144c   :  { %v2609_v12 = vpop.eup %2608 }
0x144d   :  { %1244 = vrot.lane.b32.xlu0 %v2609_v12, %s2759_s25 }
0x144e   :  { %v2611_v13 = vpop.eup %2610 }
0x144f   :  { %v1240_v61 = vadd.f32 1.0, %v2611_v13 }
0x1451   :  { %2612 = vrcp.f32 %v1240_v61 }
0x145b   :  { %v2613_v11 = vpop.eup %2612 }
0x145c   :  { %v1246_v15 = vmul.f32 0.0, %v2613_v11 }
0x14bf   :  { %v1245_v59 = vpop.permute.xlu0 %1244 }
0x14c0   :  { %v1247_v14 = vmul.f32 %v2613_v11, %v1245_v59 }
0x14c2   :  { %1249 = vrot.lane.b32.xlu1 %v1247_v14, %s2760_s3 }
0x1534   :  { %v1250_v16 = vpop.permute.xlu1 %1249 }
0x1535   :  { %v1252_v17 = vadd.f32 %v1250_v16, %v1246_v15 }
0x1537   :  { %2614 = vtanh.f32 %v1252_v17 }
0x1538   :  { %2616 = vtanh.f32 %v986_v3  ;;  %v1138_v3 = vadd.f32 %v3070_v8, %v3016_v38 }
0x1539   :  { %2618 = vpow2.f32 %v2071_v20 }
0x1541   :  { %v2615_v18 = vpop.eup %2614 }
0x1542   :  { %1255 = vrot.lane.b32.xlu0 %v2615_v18, %s2759_s25  ;;  %v2617_v19 = vpop.eup %2616 }
0x1543   :  { %v2619_v21 = vpop.eup %2618 }
0x1544   :  { %v990_v22 = vadd.f32 1.0, %v2619_v21 }
0x1546   :  { %994 = vrot.lane.b32.xlu0 %v2617_v19, %s2759_s25  ;;  %2620 = vrcp.f32 %v990_v22  ;;  %v1143_v19 = vadd.f32 %v3014_v36, %v3070_v8 }
0x1550   :  { %v2621_v25 = vpop.eup %2620 }
0x1551   :  { %v996_v29 = vmul.f32 %v2621_v25, %v3024_v48 }
0x15b4   :  { %v1256_v23 = vpop.permute.xlu0 %1255 }
0x15b5   :  { %v1258_v24 = vmul.f32 %v2613_v11, %v1256_v23 }
0x15b7   :  { %1260 = vrot.lane.b32.xlu1 %v1258_v24, %s2760_s3 }
0x15b8   :  { %v995_v26 = vpop.permute.xlu0 %994 }
0x15b9   :  { %v997_v27 = vmul.f32 %v2621_v25, %v995_v26 }
0x15bb   :  { %999 = vrot.lane.b32.xlu0 %v997_v27, %s2760_s3 }
0x1629   :  { %v1261_v28 = vpop.permute.xlu1 %1260 }
0x162a   :  { %2349 = vmatmul.mubr.msk.f32.vlgmr.msra.gmra.mrb[12].mxu1 %vm212_vm2, %v1261_v28 }
0x162b   :  { %2508 = vmatpush3.bf16.msra.mxu1 %v3034_v52  ;;  %2370 = vmatprep.mubr.msk.f32.mxu1 %vm2757_vm0, %v2758_v1 }
0x162c   :  { %2509 = vmatprep.subr.bf16.mxu1 %v2756_v0 }
0x162d   :  { %v1000_v30 = vpop.permute.xlu0 %999 }
0x162e   :  { %v1002_v31 = vadd.f32 %v1000_v30, %v996_v29 }
0x162f   :  { %2511 = vmatpush3.bf16.msra.mxu1 %v3044_v55 }
0x1630   :  { %2622 = vtanh.f32 %v1002_v31  ;;  %2518 = vmatprep.subr.bf16.mxu1 %v2756_v0 }
0x163a   :  { %v2623_v32 = vpop.eup %2622 }
0x163b   :  { %1005 = vrot.lane.b32.xlu0 %v2623_v32, %s2759_s25 }
0x16ad   :  { %v1006_v33 = vpop.permute.xlu0 %1005 }
0x16ae   :  { %v1008_v35 = vmul.f32 %v2621_v25, %v1006_v33 }
0x16b0   :  { %1010 = vrot.lane.b32.xlu0 %v1008_v35, %s2760_s3 }
0x16fd   :  { %v1330_v41 = vpop.f32.mrb[12].mxu1 }
0x16fe   :  { %v1334_v62 = vadd.f32 %v1330_v41, %v1133_v37  ;;  %v2350_v42 = vpop.f32.mrb[13].mxu1  ;;  %v1148_v41 = vadd.f32 %v3070_v8, %v3021_v40 }
0x1700   :  { %2624 = vtanh.f32 %v1334_v62  ;;  %v2083_v46 = vmul.f32 -1.442695, %v1334_v62 }
0x1702   :  { %2626 = vpow2.f32 %v2083_v46 }
0x170a   :  { %v2625_v43 = vpop.eup %2624 }
0x170b   :  { %1342 = vrot.lane.b32.xlu1 %v2625_v43, %s2759_s25 }
0x170c   :  { %v2627_v47 = vpop.eup %2626 }
0x170d   :  { %v1338_v34 = vadd.f32 1.0, %v2627_v47 }
0x170f   :  { %2628 = vrcp.f32 %v1338_v34 }
0x1719   :  { %v2629_v48 = vpop.eup %2628 }
0x171a   :  { %v1344_v51 = vmul.f32 %v2629_v48, %v1252_v17 }
0x1722   :  { %v1011_v44 = vpop.permute.xlu0 %1010 }
0x1723   :  { %1013 = vst.msk [vmem:[#allocation2 + $0x38] sm:$0xff] %vm212_vm2, %v1011_v44 }
0x172a   :  { %v1030_v45 = vld [vmem:[#allocation2 + $0x38] sm:$0xff] }
0x172b   :  { %2327 = vmatmul.mubr.msk.f32.gmra.mrb[20].mxu0 %vm212_vm2, %v1030_v45 }
0x172c   :  { %2359 = vmatprep.mubr.msk.f32.mxu0 %vm2757_vm0, %v2758_v1 }
0x177d   :  { %v1343_v49 = vpop.permute.xlu1 %1342 }
0x177e   :  { %v1345_v50 = vmul.f32 %v2629_v48, %v1343_v49 }
0x1780   :  { %1347 = vrot.lane.b32.xlu1 %v1345_v50, %s2760_s3 }
0x17f2   :  { %v1348_v53 = vpop.permute.xlu1 %1347 }
0x17f3   :  { %v1350_v54 = vadd.f32 %v1348_v53, %v1344_v51 }
0x17f5   :  { %2630 = vtanh.f32 %v1350_v54 }
0x17fe   :  { %v3097_v56 = vpop.f32.mrb[20].mxu0 }
0x17ff   :  { %v2631_v57 = vpop.eup %2630  ;;  %v3099_v58 = vpop.f32.mrb[21].mxu0 }
0x1800   :  { %1353 = vrot.lane.b32.xlu1 %v2631_v57, %s2759_s25 }
0x1872   :  { %v1354_v60 = vpop.permute.xlu1 %1353 }
0x1873   :  { %v1356_v63 = vmul.f32 %v2629_v48, %v1354_v60 }
0x1875   :  { %1358 = vrot.lane.b32.xlu1 %v1356_v63, %s2760_s3  ;;  %v1153_v63 = vadd.f32 %v3019_v39, %v3070_v8 }
0x18e7   :  { %v1359_v2 = vpop.permute.xlu1 %1358 }
0x18e8   :  { %2360 = vmatmul.mubr.msk.f32.vlgmr.msra.gmra.mrb[22].mxu0 %vm212_vm2, %v1359_v2 }
0x18e9   :  { %2514 = vmatpush3.bf16.msra.mxu0 %v3034_v52  ;;  %2381 = vmatprep.mubr.msk.f32.mxu0 %vm2757_vm0, %v2758_v1 }
0x18ea   :  { %2515 = vmatprep.subr.bf16.mxu0 %v2756_v0 }
0x18ed   :  { %2517 = vmatpush3.bf16.msra.mxu0 %v3044_v55 }
0x18ee   :  { %2524 = vmatprep.subr.bf16.mxu0 %v2756_v0 }
0x19bb   :  { %v1428_v4 = vpop.f32.mrb[22].mxu0 }
0x19bc   :  { %v1432_v5 = vadd.f32 %v1428_v4, %v1138_v3  ;;  %v2361_v6 = vpop.f32.mrb[23].mxu0 }
0x19be   :  { %2632 = vtanh.f32 %v1432_v5  ;;  %v2085_v9 = vmul.f32 -1.442695, %v1432_v5 }
0x19c0   :  { %2634 = vpow2.f32 %v2085_v9 }
0x19c8   :  { %v2633_v7 = vpop.eup %2632 }
0x19c9   :  { %1440 = vrot.lane.b32.xlu0 %v2633_v7, %s2759_s25 }
0x19ca   :  { %v2635_v12 = vpop.eup %2634 }
0x19cb   :  { %v1436_v10 = vadd.f32 1.0, %v2635_v12 }
0x19cd   :  { %2636 = vrcp.f32 %v1436_v10 }
0x19d7   :  { %v2637_v13 = vpop.eup %2636 }
0x19d8   :  { %v1442_v59 = vmul.f32 %v2637_v13, %v1350_v54 }
0x1a3b   :  { %v1441_v61 = vpop.permute.xlu0 %1440 }
0x1a3c   :  { %v1443_v11 = vmul.f32 %v2637_v13, %v1441_v61 }
0x1a3e   :  { %1445 = vrot.lane.b32.xlu1 %v1443_v11, %s2760_s3 }
0x1ab0   :  { %v1446_v14 = vpop.permute.xlu1 %1445 }
0x1ab1   :  { %v1448_v38 = vadd.f32 %v1446_v14, %v1442_v59 }
0x1ab3   :  { %2638 = vtanh.f32 %v1448_v38 }
0x1abd   :  { %v2639_v15 = vpop.eup %2638 }
0x1abe   :  { %1451 = vrot.lane.b32.xlu0 %v2639_v15, %s2759_s25 }
0x1b30   :  { %v1452_v16 = vpop.permute.xlu0 %1451 }
0x1b31   :  { %v1454_v17 = vmul.f32 %v2637_v13, %v1452_v16 }
0x1b33   :  { %1456 = vrot.lane.b32.xlu1 %v1454_v17, %s2760_s3 }
0x1ba5   :  { %v1457_v18 = vpop.permute.xlu1 %1456 }
0x1ba6   :  { %2371 = vmatmul.mubr.msk.f32.vlgmr.msra.gmra.mrb[14].mxu1 %vm212_vm2, %v1457_v18 }
0x1ba7   :  { %2520 = vmatpush3.bf16.msra.mxu1 %v3034_v52  ;;  %2392 = vmatprep.mubr.msk.f32.mxu1 %vm2757_vm0, %v2758_v1 }
0x1ba8   :  { %2521 = vmatprep.subr.bf16.mxu1 %v2756_v0 }
0x1bab   :  { %2523 = vmatpush3.bf16.msra.mxu1 %v3044_v55 }
0x1bac   :  { %2530 = vmatprep.subr.bf16.mxu1 %v2756_v0 }
0x1c79   :  { %v1526_v20 = vpop.f32.mrb[14].mxu1 }
0x1c7a   :  { %v1530_v21 = vadd.f32 %v1526_v20, %v1143_v19  ;;  %v2372_v22 = vpop.f32.mrb[15].mxu1 }
0x1c7c   :  { %2640 = vtanh.f32 %v1530_v21  ;;  %v2087_v24 = vmul.f32 -1.442695, %v1530_v21 }
0x1c7e   :  { %2642 = vpow2.f32 %v2087_v24 }
0x1c86   :  { %v2641_v23 = vpop.eup %2640 }
0x1c87   :  { %1538 = vrot.lane.b32.xlu0 %v2641_v23, %s2759_s25 }
0x1c88   :  { %v2643_v25 = vpop.eup %2642 }
0x1c89   :  { %v1534_v26 = vadd.f32 1.0, %v2643_v25 }
0x1c8b   :  { %2644 = vrcp.f32 %v1534_v26 }
0x1c95   :  { %v2645_v27 = vpop.eup %2644 }
0x1c96   :  { %v1540_v30 = vmul.f32 %v2645_v27, %v1448_v38  ;;  %v1158_v38 = vadd.f32 %v3070_v8, %v3099_v58 }
0x1cf9   :  { %v1539_v28 = vpop.permute.xlu0 %1538 }
0x1cfa   :  { %v1541_v29 = vmul.f32 %v2645_v27, %v1539_v28 }
0x1cfc   :  { %1543 = vrot.lane.b32.xlu1 %v1541_v29, %s2760_s3 }
0x1d6e   :  { %v1544_v31 = vpop.permute.xlu1 %1543 }
0x1d6f   :  { %v1546_v36 = vadd.f32 %v1544_v31, %v1540_v30  ;;  %v1163_v30 = vadd.f32 %v3097_v56, %v3070_v8  ;;  %v1945_v56 = vld [vmem:[#allocation6] sm:$0xff] }
0x1d71   :  { %2646 = vtanh.f32 %v1546_v36 }
0x1d7b   :  { %v2647_v32 = vpop.eup %2646 }
0x1d7c   :  { %1549 = vrot.lane.b32.xlu0 %v2647_v32, %s2759_s25 }
0x1dee   :  { %v1550_v33 = vpop.permute.xlu0 %1549 }
0x1def   :  { %v1552_v35 = vmul.f32 %v2645_v27, %v1550_v33 }
0x1df1   :  { %1554 = vrot.lane.b32.xlu1 %v1552_v35, %s2760_s3 }
0x1e63   :  { %v1555_v37 = vpop.permute.xlu1 %1554 }
0x1e64   :  { %2382 = vmatmul.mubr.msk.f32.vlgmr.msra.gmra.mrb[24].mxu0 %vm212_vm2, %v1555_v37 }
0x1e65   :  { %2526 = vmatpush3.bf16.msra.mxu0 %v3034_v52  ;;  %2403 = vmatprep.mubr.msk.f32.mxu0 %vm2757_vm0, %v2758_v1 }
0x1e66   :  { %2527 = vmatprep.subr.bf16.mxu0 %v2756_v0 }
0x1e69   :  { %2529 = vmatpush3.bf16.msra.mxu0 %v3044_v55 }
0x1e6a   :  { %2536 = vmatprep.subr.bf16.mxu0 %v2756_v0 }
0x1f37   :  { %v1624_v62 = vpop.f32.mrb[24].mxu0 }
0x1f38   :  { %v1628_v42 = vadd.f32 %v1624_v62, %v1148_v41  ;;  %v2383_v43 = vpop.f32.mrb[25].mxu0 }
0x1f3a   :  { %2648 = vtanh.f32 %v1628_v42  ;;  %v2089_v45 = vmul.f32 -1.442695, %v1628_v42 }
0x1f3c   :  { %2650 = vpow2.f32 %v2089_v45 }
0x1f44   :  { %v2649_v44 = vpop.eup %2648 }
0x1f45   :  { %1636 = vrot.lane.b32.xlu0 %v2649_v44, %s2759_s25 }
0x1f46   :  { %v2651_v46 = vpop.eup %2650 }
0x1f47   :  { %v1632_v47 = vadd.f32 1.0, %v2651_v46  ;;  %v1946_v46 = vld [vmem:[#allocation6 + $0x8] sm:$0xff] }
0x1f49   :  { %2652 = vrcp.f32 %v1632_v47  ;;  %v1947_v47 = vld [vmem:[#allocation6 + $0x10] sm:$0xff] }
0x1f53   :  { %v2653_v34 = vpop.eup %2652 }
0x1f54   :  { %v1638_v50 = vmul.f32 %v2653_v34, %v1546_v36 }
0x1fb7   :  { %v1637_v48 = vpop.permute.xlu0 %1636 }
0x1fb8   :  { %v1639_v49 = vmul.f32 %v2653_v34, %v1637_v48  ;;  %v1948_v48 = vld [vmem:[#allocation6 + $0x18] sm:$0xff] }
0x1fba   :  { %1641 = vrot.lane.b32.xlu1 %v1639_v49, %s2760_s3  ;;  %v2540_v49 = vpack.c.bf16 %v1948_v48, %v1947_v47 }
0x202c   :  { %v1642_v51 = vpop.permute.xlu1 %1641 }
0x202d   :  { %v1644_v40 = vadd.f32 %v1642_v51, %v1638_v50 }
0x202f   :  { %2654 = vtanh.f32 %v1644_v40 }
0x2039   :  { %v2655_v53 = vpop.eup %2654 }
0x203a   :  { %1647 = vrot.lane.b32.xlu0 %v2655_v53, %s2759_s25 }
0x20ac   :  { %v1648_v54 = vpop.permute.xlu0 %1647 }
0x20ad   :  { %v1650_v57 = vmul.f32 %v2653_v34, %v1648_v54  ;;  %v2537_v34 = vpack.c.bf16 %v1946_v46, %v1945_v56  ;;  %v2096_v54 = vld [vmem:[%s3195_s8] ss:$0 sm:$0xff] }
0x20af   :  { %1652 = vrot.lane.b32.xlu1 %v1650_v57, %s2760_s3 }
0x2121   :  { %v1653_v60 = vpop.permute.xlu1 %1652 }
0x2122   :  { %2393 = vmatmul.mubr.msk.f32.vlgmr.msra.gmra.mrb[16].mxu1 %vm212_vm2, %v1653_v60 }
0x2123   :  { %2532 = vmatpush3.bf16.msra.mxu1 %v3034_v52  ;;  %2414 = vmatprep.mubr.msk.f32.mxu1 %vm2757_vm0, %v2758_v1 }
0x2124   :  { %2533 = vmatprep.subr.bf16.mxu1 %v2756_v0 }
0x2127   :  { %2535 = vmatpush3.bf16.msra.mxu1 %v3044_v55 }
0x21f5   :  { %v1722_v2 = vpop.f32.mrb[16].mxu1 }
0x21f6   :  { %v1726_v3 = vadd.f32 %v1722_v2, %v1153_v63  ;;  %v2394_v4 = vpop.f32.mrb[17].mxu1 }
0x21f8   :  { %2656 = vtanh.f32 %v1726_v3  ;;  %v2091_v6 = vmul.f32 -1.442695, %v1726_v3 }
0x21fa   :  { %2658 = vpow2.f32 %v2091_v6 }
0x2202   :  { %v2657_v5 = vpop.eup %2656 }
0x2203   :  { %1734 = vrot.lane.b32.xlu0 %v2657_v5, %s2759_s25 }
0x2204   :  { %v2659_v52 = vpop.eup %2658 }
0x2205   :  { %v1730_v7 = vadd.f32 1.0, %v2659_v52 }
0x2207   :  { %2660 = vrcp.f32 %v1730_v7 }
0x2211   :  { %v2661_v9 = vpop.eup %2660 }
0x2212   :  { %v1736_v55 = vmul.f32 %v2661_v9, %v1644_v40 }
0x2275   :  { %v1735_v12 = vpop.permute.xlu0 %1734 }
0x2276   :  { %v1737_v10 = vmul.f32 %v2661_v9, %v1735_v12 }
0x2278   :  { %1739 = vrot.lane.b32.xlu1 %v1737_v10, %s2760_s3 }
0x22ea   :  { %v1740_v13 = vpop.permute.xlu1 %1739 }
0x22eb   :  { %v1742_v39 = vadd.f32 %v1740_v13, %v1736_v55 }
0x22ed   :  { %2662 = vtanh.f32 %v1742_v39 }
0x22f7   :  { %v2663_v61 = vpop.eup %2662 }
0x22f8   :  { %1745 = vrot.lane.b32.xlu0 %v2663_v61, %s2759_s25 }
0x236a   :  { %v1746_v11 = vpop.permute.xlu0 %1745 }
0x236b   :  { %v1748_v59 = vmul.f32 %v2661_v9, %v1746_v11 }
0x236d   :  { %1750 = vrot.lane.b32.xlu1 %v1748_v59, %s2760_s3 }
0x23df   :  { %v1751_v14 = vpop.permute.xlu1 %1750 }
0x23e0   :  { %2404 = vmatmul.mubr.msk.f32.vlgmr.msra.gmra.mrb[26].mxu0 %vm212_vm2, %v1751_v14 }
0x23e1   :  { %2425 = vmatprep.mubr.msk.f32.mxu0 %vm2757_vm0, %v2758_v1  ;;  %2538 = vmatpush3.bf16.msra.mxu0 %v2537_v34 }
0x23e2   :  { %2539 = vmatprep.subr.bf16.mxu0 %v2756_v0 }
0x23e5   :  { %2541 = vmatpush3.bf16.msra.mxu0 %v2540_v49 }
0x24b3   :  { %v1820_v15 = vpop.f32.mrb[26].mxu0 }
0x24b4   :  { %v1824_v16 = vadd.f32 %v1820_v15, %v1158_v38  ;;  %v2405_v17 = vpop.f32.mrb[27].mxu0 }
0x24b6   :  { %2664 = vtanh.f32 %v1824_v16  ;;  %v2093_v19 = vmul.f32 -1.442695, %v1824_v16 }
0x24b8   :  { %2666 = vpow2.f32 %v2093_v19 }
0x24c0   :  { %v2665_v18 = vpop.eup %2664 }
0x24c1   :  { %1832 = vrot.lane.b32.xlu0 %v2665_v18, %s2759_s25 }
0x24c2   :  { %v2667_v20 = vpop.eup %2666 }
0x24c3   :  { %v1828_v21 = vadd.f32 1.0, %v2667_v20 }
0x24c5   :  { %2668 = vrcp.f32 %v1828_v21 }
0x24cf   :  { %v2669_v22 = vpop.eup %2668 }
0x24d0   :  { %v1834_v1 = vmul.f32 %v2669_v22, %v1742_v39 }
0x2533   :  { %v1833_v23 = vpop.permute.xlu0 %1832 }
0x2534   :  { %v1835_v24 = vmul.f32 %v2669_v22, %v1833_v23 }
0x2536   :  { %1837 = vrot.lane.b32.xlu1 %v1835_v24, %s2760_s3 }
0x25a8   :  { %v1838_v25 = vpop.permute.xlu1 %1837 }
0x25a9   :  { %v1840_v58 = vadd.f32 %v1838_v25, %v1834_v1 }
0x25ab   :  { %2670 = vtanh.f32 %v1840_v58 }
0x25b5   :  { %v2671_v26 = vpop.eup %2670 }
0x25b6   :  { %1843 = vrot.lane.b32.xlu0 %v2671_v26, %s2759_s25 }
0x2628   :  { %v1844_v27 = vpop.permute.xlu0 %1843 }
0x2629   :  { %v1846_v28 = vmul.f32 %v2669_v22, %v1844_v27 }
0x262b   :  { %1848 = vrot.lane.b32.xlu1 %v1846_v28, %s2760_s3 }
0x269d   :  { %v1849_v29 = vpop.permute.xlu1 %1848 }
0x269e   :  { %2415 = vmatmul.mubr.msk.f32.vlgmr.msra.gmra.mrb[18].mxu1 %vm212_vm2, %v1849_v29 }
0x2771   :  { %v1918_v31 = vpop.f32.mrb[18].mxu1 }
0x2772   :  { %v1922_v36 = vadd.f32 %v1918_v31, %v1163_v30  ;;  %v2416_v32 = vpop.f32.mrb[19].mxu1 }
0x2774   :  { %2672 = vtanh.f32 %v1922_v36  ;;  %v2095_v35 = vmul.f32 -1.442695, %v1922_v36 }
0x2776   :  { %2674 = vpow2.f32 %v2095_v35 }
0x277e   :  { %v2673_v33 = vpop.eup %2672 }
0x277f   :  { %1930 = vrot.lane.b32.xlu0 %v2673_v33, %s2759_s25 }
0x2780   :  { %v2675_v37 = vpop.eup %2674 }
0x2781   :  { %v1926_v41 = vadd.f32 1.0, %v2675_v37 }
0x2783   :  { %2676 = vrcp.f32 %v1926_v41 }
0x278d   :  { %v2677_v62 = vpop.eup %2676 }
0x278e   :  { %v1932_v44 = vmul.f32 %v2677_v62, %v1840_v58 }
0x27f1   :  { %v1931_v42 = vpop.permute.xlu0 %1930 }
0x27f2   :  { %v1933_v43 = vmul.f32 %v2677_v62, %v1931_v42 }
0x27f4   :  { %1935 = vrot.lane.b32.xlu1 %v1933_v43, %s2760_s3 }
0x2866   :  { %v1936_v45 = vpop.permute.xlu1 %1935 }
0x2867   :  { %v1938_v8 = vadd.f32 %v1936_v45, %v1932_v44 }
0x2869   :  { %2678 = vtanh.f32 %v1938_v8 }
0x2873   :  { %v2679_v50 = vpop.eup %2678 }
0x2874   :  { %1941 = vrot.lane.b32.xlu0 %v2679_v50, %s2759_s25 }
0x28e6   :  { %v1942_v51 = vpop.permute.xlu0 %1941 }
0x28e7   :  { %v1944_v40 = vmul.f32 %v2677_v62, %v1942_v51 }
0x28e9   :  { %1957 = vrot.lane.b32.xlu1 %v1944_v40, %s2760_s3 }
0x295b   :  { %v1958_v53 = vpop.permute.xlu1 %1957 }
0x295c   :  { %2426 = vmatmul.mubr.msk.f32.vlgmr.msra.gmra.mrb[28].mxu0 %vm212_vm2, %v1958_v53 }
0x2a2f   :  { %v2027_v57 = vpop.f32.mrb[28].mxu0 }
0x2a30   :  { %v2028_v60 = vadd.f32 %v2096_v54, %v2027_v57  ;;  %v2427_v0 = vpop.f32.mrb[29].mxu0 }
0x2a32   :  { %2031 = vst [vmem:[#allocation8] sm:$0xff] %v2028_v60 }
0x2a33   :  { %2735 = shalt.err (!%p2732_p6)
}
0x2a34   :  { %s2736_s10 = scalar_lea.hbm %s3196_s9, 128 }
0x2a35   :  { %p2737_p7 = scmp.ne.s32.totalorder %s3196_s9, %s2736_s10  ;;  %p2740_p8 = scmp.lt.u32.totalorder %s2736_s10, %s3196_s9 }
0x2a37   :  { %p2742_p9 = pnand %p2740_p8, %p2737_p7 }
0x2a39   :  { %2745 = shalt.err (!%p2742_p9)
}
0x2a3a   :  { %2041 = dma.vmem_to_hbm [thread:$0]  %s2039_s12, 128, %s3196_s9, [#allocation5]  }
0x2a3b   :  { %2750 = dma.done.wait [#allocation5], 128  }
0x2a3c   :  { %2751 = vsyncadd [#allocation5], 4294967168 }
0x2a3d   :  { %2045 = vsyncpa [#allocation4], 1 }
0x2a3e   :  { %2046 = vsyncpa [#allocation7], 1 }
0x2a3f   :  { %2047 = vsyncpa [#allocation5], 1 }

</bundles_post_ra>
